<compile_context>
chip_gen: v6e
topology: v6e:2x2x1
jax: 0.10.0
libtpu: 0.0.40
codegen_flags: <defaults>
</compile_context>

<pallas_src>
import functools

import numpy as np

import jax
import jax.numpy as jnp
from jax import lax
from jax.experimental import pallas as pl
from jax.experimental.pallas import tpu as pltpu


def _round_up(v, m):
    return ((v + m - 1) // m) * m


def _a_index_map(i, kk, kt_ref, kc_ref):
    # k_table already clamps out-of-range kk to the last valid diagonal tile:
    # the block index is then unchanged from the previous step, so Pallas skips
    # the DMA for those (gated-off) steps.
    del kc_ref
    return i, kt_ref[i, kk]


# ---------------------------------------------------------------------------
# Pass 1: H2pre[i] = relu(sum_k A_hat[i,k] @ XW1[k] + b1) @ W2
#   (GCNConv1 in PyG order A_hat @ (X W1), fused with ReLU and the feature
#    transform of GCNConv2; dropout is identity in eval mode.)
# ---------------------------------------------------------------------------
def _conv1_kernel(kt_ref, kc_ref, a_ref, xw1_ref, b1_ref, w2_ref,
                  out_ref, acc_ref, *, tile):
    i = pl.program_id(0)
    kk = pl.program_id(1)

    @pl.when(kk == 0)
    def _():
        acc_ref[...] = jnp.zeros_like(acc_ref)

    @pl.when(kk < kc_ref[i])          # skip out-of-range (all-zero) A_hat tiles
    def _():
        k_abs = kt_ref[i, kk]
        row0 = pl.multiple_of(k_abs * tile, tile)
        rhs = xw1_ref[pl.ds(row0, tile), :]            # resident RHS, in-kernel slice
        acc_ref[...] += jnp.dot(a_ref[...], rhs,
                                preferred_element_type=jnp.float32)

    @pl.when(kk == pl.num_programs(1) - 1)
    def _():
        h1 = jnp.maximum(acc_ref[...] + b1_ref[...], 0.0)     # GCNConv1 + ReLU
        h2pre = jnp.dot(h1.astype(jnp.bfloat16), w2_ref[...],
                        preferred_element_type=jnp.float32)   # GCNConv2 feature xform
        out_ref[...] = h2pre.astype(out_ref.dtype)


# ---------------------------------------------------------------------------
# Pass 2: partial_pool[i] = P[:, i-tile] @ relu(sum_k A_hat[i,k] @ H2pre[k] + b2)
#   (per-row-tile partial mean pools -> row-tile axis is megacore-parallel)
# ---------------------------------------------------------------------------
def _conv2_pool_kernel(kt_ref, kc_ref, a_ref, h_ref, b2_ref, p_ref,
                       out_ref, acc_ref, *, tile):
    i = pl.program_id(0)
    kk = pl.program_id(1)

    @pl.when(kk == 0)
    def _():
        acc_ref[...] = jnp.zeros_like(acc_ref)

    @pl.when(kk < kc_ref[i])
    def _():
        k_abs = kt_ref[i, kk]
        row0 = pl.multiple_of(k_abs * tile, tile)
        rhs = h_ref[pl.ds(row0, tile), :]
        acc_ref[...] += jnp.dot(a_ref[...], rhs,
                                preferred_element_type=jnp.float32)

    @pl.when(kk == pl.num_programs(1) - 1)
    def _():
        h2 = jnp.maximum(acc_ref[...] + b2_ref[...], 0.0)     # GCNConv2 + ReLU
        out_ref[...] = jnp.dot(p_ref[...], h2.astype(jnp.bfloat16),
                               preferred_element_type=jnp.float32)


# ---------------------------------------------------------------------------
# Pass 3 (tiny): pool = sum_i partial_pool[i]; MLP head; masked log_softmax
# ---------------------------------------------------------------------------
def _head_kernel(part_ref, wm1_ref, bm1_ref, wm2_ref, bm2_ref, out_ref,
                 *, n_classes):
    pool = jnp.sum(part_ref[...], axis=0)                     # (Gp, Hp) f32
    g = jnp.dot(pool.astype(jnp.bfloat16), wm1_ref[...],
                preferred_element_type=jnp.float32) + bm1_ref[...]
    g = jnp.dot(g.astype(jnp.bfloat16), wm2_ref[...],
                preferred_element_type=jnp.float32) + bm2_ref[...]
    cls = lax.broadcasted_iota(jnp.int32, g.shape, 1)
    g = jnp.where(cls < n_classes, g, jnp.float32(-1e30))     # mask padded classes
    m = jnp.max(g, axis=1, keepdims=True)
    z = g - m
    lse = jnp.log(jnp.sum(jnp.exp(z), axis=1, keepdims=True))
    out_ref[...] = z - lse


# ---------------------------------------------------------------------------
# Shared glue: dense symmetric-normalized adjacency with self-loops, built
# directly in bf16 (no O(N^2) f32 intermediate).
# ---------------------------------------------------------------------------
def _build_normalized_adjacency(edge_index, n_nodes, n_padded):
    src, dst = edge_index[0], edge_index[1]
    idx = jnp.arange(n_nodes)
    deg = jnp.zeros((n_nodes,), jnp.float32).at[dst].add(1.0) + 1.0  # in-deg + self-loop
    dinv = lax.rsqrt(deg)
    a = jnp.zeros((n_padded, n_padded), jnp.bfloat16)
    a = a.at[dst, src].add((dinv[dst] * dinv[src]).astype(jnp.bfloat16))
    a = a.at[idx, idx].add((dinv * dinv).astype(jnp.bfloat16))
    return a


# ---------------------------------------------------------------------------
# Jitted pipeline (schedule arrays come from the host wrapper)
# ---------------------------------------------------------------------------
@functools.partial(jax.jit, static_argnames=("n_graphs", "tile", "max_kk"))
def _gcn2mlp2_jit(x, edge_index, batch, k_table, k_count, params,
                  *, n_graphs, tile, max_kk):
    w1, b1, w2, b2, wm1, bm1, wm2, bm2 = params
    N = x.shape[0]
    H = w1.shape[1]
    C = wm2.shape[1]

    Np = _round_up(N, tile)
    Hp = _round_up(H, 128)
    Cp = _round_up(C, 128)
    Gp = _round_up(n_graphs, 8)
    nI = Np // tile

    A_hat = _build_normalized_adjacency(edge_index, N, Np)     # (Np, Np) bf16

    # Mean-pool matrix P (Gp, Np), bf16; padded nodes / graphs get zero weight.
    bpad = jnp.full((Np,), -1, jnp.int32).at[:N].set(batch.astype(jnp.int32))
    onehot = (bpad[None, :] ==
              jnp.arange(Gp, dtype=jnp.int32)[:, None]).astype(jnp.float32)
    counts = jnp.maximum(onehot.sum(axis=1, keepdims=True), 1.0)
    P = (onehot / counts).astype(jnp.bfloat16)

    def pad2(a, r, c, dtype):
        out = jnp.zeros((r, c), dtype)
        return out.at[:a.shape[0], :a.shape[1]].set(a.astype(dtype))

    xw1 = x @ w1                                   # tiny (N, emb) x (emb, H)
    XW1p = pad2(xw1, Np, Hp, jnp.bfloat16)
    B1p = pad2(b1, 1, Hp, jnp.float32)
    W2p = pad2(w2, Hp, Hp, jnp.bfloat16)
    B2p = pad2(b2, 1, Hp, jnp.float32)
    Wm1p = pad2(wm1, Hp, Hp, jnp.bfloat16)
    Bm1p = pad2(bm1, 1, Hp, jnp.float32)
    Wm2p = pad2(wm2, Hp, Cp, jnp.bfloat16)
    Bm2p = pad2(bm2, 1, Cp, jnp.float32)

    # ------------------------------ pass 1 -----------------------------------
    h2pre = pl.pallas_call(
        functools.partial(_conv1_kernel, tile=tile),
        out_shape=jax.ShapeDtypeStruct((Np, Hp), jnp.bfloat16),
        grid_spec=pltpu.PrefetchScalarGridSpec(
            num_scalar_prefetch=2,
            grid=(nI, max_kk),
            in_specs=[
                pl.BlockSpec((tile, tile), _a_index_map),                # A_hat tile
                pl.BlockSpec((Np, Hp), lambda i, kk, kt, kc: (0, 0)),    # XW1 (resident)
                pl.BlockSpec((1, Hp), lambda i, kk, kt, kc: (0, 0)),     # b1 (resident)
                pl.BlockSpec((Hp, Hp), lambda i, kk, kt, kc: (0, 0)),    # W2 (resident)
            ],
            out_specs=pl.BlockSpec((tile, Hp), lambda i, kk, kt, kc: (i, 0)),
            scratch_shapes=[pltpu.VMEM((tile, Hp), jnp.float32)],
        ),
        compiler_params=pltpu.CompilerParams(
            dimension_semantics=("parallel", "arbitrary")),
        cost_estimate=pl.CostEstimate(
            flops=2 * nI * max_kk * tile * tile * Hp + 2 * Np * Hp * Hp,
            transcendentals=0,
            bytes_accessed=2 * nI * max_kk * tile * tile + 2 * Np * Hp
                           + 2 * Hp * Hp + 4 * Hp + 2 * Np * Hp),
    )(k_table, k_count, A_hat, XW1p, B1p, W2p)

    # ------------------------------ pass 2 -----------------------------------
    partial_pools = pl.pallas_call(
        functools.partial(_conv2_pool_kernel, tile=tile),
        out_shape=jax.ShapeDtypeStruct((nI, Gp, Hp), jnp.float32),
        grid_spec=pltpu.PrefetchScalarGridSpec(
            num_scalar_prefetch=2,
            grid=(nI, max_kk),
            in_specs=[
                pl.BlockSpec((tile, tile), _a_index_map),                # A_hat tile
                pl.BlockSpec((Np, Hp), lambda i, kk, kt, kc: (0, 0)),    # H2pre (resident)
                pl.BlockSpec((1, Hp), lambda i, kk, kt, kc: (0, 0)),     # b2 (resident)
                pl.BlockSpec((Gp, tile), lambda i, kk, kt, kc: (0, i)),  # P cols for tile i
            ],
            out_specs=pl.BlockSpec((None, Gp, Hp),
                                   lambda i, kk, kt, kc: (i, 0, 0)),
            scratch_shapes=[pltpu.VMEM((tile, Hp), jnp.float32)],
        ),
        compiler_params=pltpu.CompilerParams(
            dimension_semantics=("parallel", "arbitrary")),
        cost_estimate=pl.CostEstimate(
            flops=2 * nI * max_kk * tile * tile * Hp + 2 * Gp * Np * Hp,
            transcendentals=0,
            bytes_accessed=2 * nI * max_kk * tile * tile + 2 * Np * Hp
                           + 2 * Gp * Np + 4 * Hp + 4 * nI * Gp * Hp),
    )(k_table, k_count, A_hat, h2pre, B2p, P)

    # ------------------------------ pass 3 (head) -----------------------------
    out_padded = pl.pallas_call(
        functools.partial(_head_kernel, n_classes=C),
        out_shape=jax.ShapeDtypeStruct((Gp, Cp), jnp.float32),
        grid_spec=pltpu.PrefetchScalarGridSpec(
            num_scalar_prefetch=0,
            grid=(1,),
            in_specs=[
                pl.BlockSpec((nI, Gp, Hp), lambda i: (0, 0, 0)),
                pl.BlockSpec((Hp, Hp), lambda i: (0, 0)),
                pl.BlockSpec((1, Hp), lambda i: (0, 0)),
                pl.BlockSpec((Hp, Cp), lambda i: (0, 0)),
                pl.BlockSpec((1, Cp), lambda i: (0, 0)),
            ],
            out_specs=pl.BlockSpec((Gp, Cp), lambda i: (0, 0)),
        ),
        cost_estimate=pl.CostEstimate(
            flops=2 * Gp * Hp * Hp + 2 * Gp * Hp * Cp,
            transcendentals=Gp * Cp,
            bytes_accessed=4 * nI * Gp * Hp + 2 * Hp * (Hp + Cp) + 4 * Gp * Cp),
    )(partial_pools, Wm1p, Bm1p, Wm2p, Bm2p)

    return out_padded[:n_graphs, :C]


# ---------------------------------------------------------------------------
# Host wrapper: derives the block-diagonal tile schedule from `batch`
# (page-table style), then calls the jitted Pallas pipeline.
# ---------------------------------------------------------------------------
def gcn2mlp2_forward(x, edge_index, batch, params, n_graphs, tile=256):
    N = x.shape[0]
    Np = _round_up(N, tile)
    nI = Np // tile
    nK = Np // tile

    batch_np = np.asarray(batch).astype(np.int64)
    node_idx = np.arange(N, dtype=np.int64)
    g_start = np.full((n_graphs,), N, np.int64)
    g_end = np.zeros((n_graphs,), np.int64)
    np.minimum.at(g_start, batch_np, node_idx)
    np.maximum.at(g_end, batch_np, node_idx + 1)

    # Per-node same-graph column range; padded nodes contribute nothing.
    col_lo = np.full((Np,), Np, np.int64)
    col_hi = np.zeros((Np,), np.int64)
    col_lo[:N] = g_start[batch_np]
    col_hi[:N] = g_end[batch_np]

    col_lo_t = col_lo.reshape(nI, tile).min(axis=1)
    col_hi_t = col_hi.reshape(nI, tile).max(axis=1)
    k_start = np.minimum(col_lo_t // tile, nK - 1)
    k_end = np.maximum((col_hi_t + tile - 1) // tile, k_start + 1)
    k_count = (k_end - k_start).astype(np.int32)
    max_kk = int(k_count.max())

    kk_range = np.arange(max_kk, dtype=np.int64)
    k_table = (k_start[:, None]
               + np.minimum(kk_range[None, :], (k_count - 1)[:, None])
               ).astype(np.int32)                       # (nI, max_kk)

    return _gcn2mlp2_jit(x, edge_index, batch,
                         jnp.asarray(k_table, jnp.int32),
                         jnp.asarray(k_count, jnp.int32),
                         tuple(params),
                         n_graphs=n_graphs, tile=tile, max_kk=max_kk)


# ---------------------------------------------------------------------------
# Parameters (torch-equivalent layout: y = x @ W + b, W = (in, out))
# ---------------------------------------------------------------------------
def init_params(key, emb_dim, hidden_dim, n_classes):
    ks = jax.random.split(key, 8)

    def lin(k, fin, fout):
        scale = 1.0 / jnp.sqrt(jnp.float32(fin))
        return jax.random.uniform(k, (fin, fout), jnp.float32, -scale, scale)

    w1 = lin(ks[0], emb_dim, hidden_dim)
    b1 = jnp.zeros((1, hidden_dim), jnp.float32)      # GCNConv bias init = zeros
    w2 = lin(ks[1], hidden_dim, hidden_dim)
    b2 = jnp.zeros((1, hidden_dim), jnp.float32)
    wm1 = lin(ks[2], hidden_dim, hidden_dim)
    bm1 = jax.random.uniform(ks[3], (1, hidden_dim), jnp.float32,
                             -1.0 / jnp.sqrt(hidden_dim), 1.0 / jnp.sqrt(hidden_dim))
    wm2 = lin(ks[4], hidden_dim, n_classes)
    bm2 = jax.random.uniform(ks[5], (1, n_classes), jnp.float32,
                             -1.0 / jnp.sqrt(hidden_dim), 1.0 / jnp.sqrt(hidden_dim))
    return (w1, b1, w2, b2, wm1, bm1, wm2, bm2)


# ---------------------------------------------------------------------------
# Pure-JAX reference (mirrors the kernel's bf16 quantization points)
# ---------------------------------------------------------------------------
def reference_forward(x, edge_index, batch, params, n_graphs):
    w1, b1, w2, b2, wm1, bm1, wm2, bm2 = params
    N = x.shape[0]
    bf = lambda a: a.astype(jnp.bfloat16).astype(jnp.float32)

    A_hat = _build_normalized_adjacency(edge_index, N, N).astype(jnp.float32)

    xw1 = bf(x @ w1)
    h1 = jnp.maximum(A_hat @ xw1 + b1, 0.0)
    h2pre = bf(bf(h1) @ bf(w2))
    h2 = jnp.maximum(A_hat @ h2pre + b2, 0.0)

    onehot = (batch[None, :] == jnp.arange(n_graphs)[:, None]).astype(jnp.float32)
    counts = jnp.maximum(onehot.sum(axis=1, keepdims=True), 1.0)
    pool = bf(onehot / counts) @ bf(h2)
    g = bf(pool) @ bf(wm1) + bm1
    g = bf(g) @ bf(wm2) + bm2
    return jax.nn.log_softmax(g, axis=1)


if __name__ == "__main__":
    # Small, module-consistent shapes: 6 graphs x 100 nodes (N=600 -> Np=768,
    # 3x3 tile grid at tile=256, so the prefetch-scheduled / gated accumulation
    # path is exercised with varying per-row-tile k ranges), emb=8, hidden=32,
    # 4 classes.
    emb_dim, hidden_dim, n_classes = 8, 32, 4
    n_graphs, nodes_per_graph, edges_per_graph = 6, 100, 200
    N = n_graphs * nodes_per_graph

    key = jax.random.PRNGKey(0)
    k_x, k_s, k_d, k_p = jax.random.split(key, 4)

    x = jax.random.normal(k_x, (N, emb_dim), jnp.float32)

    # Random intra-graph edges (graph g owns nodes [100g, 100(g+1))).
    offs = jnp.repeat(jnp.arange(n_graphs, dtype=jnp.int32) * nodes_per_graph,
                      edges_per_graph)
    src = jax.random.randint(k_s, (n_graphs * edges_per_graph,), 0,
                             nodes_per_graph, jnp.int32) + offs
    dst = jax.random.randint(k_d, (n_graphs * edges_per_graph,), 0,
                             nodes_per_graph, jnp.int32) + offs
    edge_index = jnp.stack([src, dst]).astype(jnp.int32)

    batch = jnp.repeat(jnp.arange(n_graphs, dtype=jnp.int32), nodes_per_graph)

    params = init_params(k_p, emb_dim, hidden_dim, n_classes)

    out = gcn2mlp2_forward(x, edge_index, batch, params, n_graphs=n_graphs)
    out = jax.block_until_ready(out)

    ref = reference_forward(x, edge_index, batch, params, n_graphs)

    assert out.shape == (n_graphs, n_classes)
    # rows of log_softmax must exp-sum to 1
    assert jnp.allclose(jnp.exp(out).sum(axis=1), 1.0, atol=1e-4)
    # structural correctness vs. plain-JAX reference
    assert jnp.allclose(out, ref, atol=3e-2), (out, ref)
    print("KERNEL_OK")
</pallas_src>

<mosaic_0001>
module attributes {stable_mosaic.version = 11 : i64} {
  func.func private @main(%arg0: i32) attributes {dimension_semantics = [#tpu.dimension_semantics<core_parallel>], iteration_bounds = array<i64: 2>, tpu.core_type = #tpu.core_type<sc_scalar_subcore>, window_params = []} {
    return
  }
}

module attributes {stable_mosaic.version = 11 : i64} {
  func.func private @main(%arg0: i32) attributes {dimension_semantics = [#tpu.dimension_semantics<core_parallel>], iteration_bounds = array<i64: 2>, tpu.core_type = #tpu.core_type<sc_scalar_subcore>, window_params = []} {
    return
  }
}

module attributes {stable_mosaic.version = 11 : i64} {
  func.func @_conv1_kernel(%arg0: i32, %arg1: i32, %arg2: memref<3x3xi32, #tpu.memory_space<smem>>, %arg3: memref<3xi32, #tpu.memory_space<smem>>, %arg4: memref<256x256xbf16, #tpu.memory_space<vmem>>, %arg5: memref<768x128xbf16, #tpu.memory_space<vmem>>, %arg6: memref<1x128xf32, #tpu.memory_space<vmem>>, %arg7: memref<128x128xbf16, #tpu.memory_space<vmem>>, %arg8: memref<256x128xbf16, #tpu.memory_space<vmem>>, %arg9: memref<256x128xf32, #tpu.memory_space<vmem>>) attributes {dimension_semantics = [#tpu.dimension_semantics<parallel>, #tpu.dimension_semantics<arbitrary>], iteration_bounds = array<i64: 3, 3>, scalar_prefetch = 2 : i64, scratch_operands = 1 : i64, tpu.core_type = #tpu.core_type<tc>, window_params = [{transform_indices = @transform_0, window_bounds = array<i64: 256, 256>}, {pipeline_mode = #tpu.pipeline_mode<synchronous>, transform_indices = @transform_1, window_bounds = array<i64: 768, 128>}, {pipeline_mode = #tpu.pipeline_mode<synchronous>, transform_indices = @transform_2, window_bounds = array<i64: 1, 128>}, {pipeline_mode = #tpu.pipeline_mode<synchronous>, transform_indices = @transform_3, window_bounds = array<i64: 128, 128>}, {transform_indices = @transform_4, window_bounds = array<i64: 256, 128>}]} {
    %c0_i32 = arith.constant 0 : i32
    %0 = arith.cmpi eq, %arg1, %c0_i32 : i32
    %1 = arith.extui %0 : i1 to i32
    %c0_i32_0 = arith.constant 0 : i32
    %2 = arith.cmpi ne, %1, %c0_i32_0 : i32
    scf.if %2 {
      %cst = arith.constant 0.000000e+00 : f32
      %11 = vector.broadcast %cst : f32 to vector<256x128xf32>
      %c0 = arith.constant 0 : index
      %c0_3 = arith.constant 0 : index
      %12 = vector.load %arg9[%c0, %c0_3] : memref<256x128xf32, #tpu.memory_space<vmem>>, vector<256x128xf32>
      tpu.vector_store %arg9[%c0, %c0_3], %11 {strides = array<i32>} : memref<256x128xf32, #tpu.memory_space<vmem>>, vector<256x128xf32>,
    } else {
    }
    %3 = arith.index_cast %arg0 : i32 to index
    %4 = memref.load %arg3[%3] : memref<3xi32, #tpu.memory_space<smem>>
    %5 = arith.cmpi slt, %arg1, %4 : i32
    %6 = arith.extui %5 : i1 to i32
    %c0_i32_1 = arith.constant 0 : i32
    %7 = arith.cmpi ne, %6, %c0_i32_1 : i32
    scf.if %7 {
      %11 = arith.index_cast %arg0 : i32 to index
      %12 = arith.index_cast %arg1 : i32 to index
      %13 = memref.load %arg2[%11, %12] : memref<3x3xi32, #tpu.memory_space<smem>>
      %c256_i32 = arith.constant 256 : i32
      %14 = arith.muli %13, %c256_i32 : i32
      %15 = tpu.assume_multiple %14, 256 : i32
      %16 = arith.index_cast %15 : i32 to index
      %c0 = arith.constant 0 : index
      %17 = vector.load %arg5[%16, %c0] : memref<768x128xbf16, #tpu.memory_space<vmem>>, vector<256x128xbf16>
      %c0_3 = arith.constant 0 : index
      %c0_4 = arith.constant 0 : index
      %18 = vector.load %arg9[%c0_3, %c0_4] : memref<256x128xf32, #tpu.memory_space<vmem>>, vector<256x128xf32>
      %c0_5 = arith.constant 0 : index
      %c0_6 = arith.constant 0 : index
      %19 = vector.load %arg4[%c0_5, %c0_6] : memref<256x256xbf16, #tpu.memory_space<vmem>>, vector<256x256xbf16>
      %cst = arith.constant dense<0.000000e+00> : vector<256x128xf32>
      %20 = tpu.matmul %19, %17, %cst {dimension_numbers = #tpu.dot_dimension_numbers<[1], [0], [0], [1], [0, 0, 1, 1], [], []>} : vector<256x256xbf16>, vector<256x128xbf16>, vector<256x128xf32> -> vector<256x128xf32>
      %21 = arith.addf %18, %20 : vector<256x128xf32>
      %c0_7 = arith.constant 0 : index
      %c0_8 = arith.constant 0 : index
      %22 = vector.load %arg9[%c0_7, %c0_8] : memref<256x128xf32, #tpu.memory_space<vmem>>, vector<256x128xf32>
      tpu.vector_store %arg9[%c0_7, %c0_8], %21 {strides = array<i32>} : memref<256x128xf32, #tpu.memory_space<vmem>>, vector<256x128xf32>,
    } else {
    }
    %c2_i32 = arith.constant 2 : i32
    %8 = arith.cmpi eq, %arg1, %c2_i32 : i32
    %9 = arith.extui %8 : i1 to i32
    %c0_i32_2 = arith.constant 0 : i32
    %10 = arith.cmpi ne, %9, %c0_i32_2 : i32
    scf.if %10 {
      %c0 = arith.constant 0 : index
      %c0_3 = arith.constant 0 : index
      %11 = vector.load %arg9[%c0, %c0_3] : memref<256x128xf32, #tpu.memory_space<vmem>>, vector<256x128xf32>
      %c0_4 = arith.constant 0 : index
      %c0_5 = arith.constant 0 : index
      %12 = vector.load %arg6[%c0_4, %c0_5] : memref<1x128xf32, #tpu.memory_space<vmem>>, vector<1x128xf32>
      %13 = vector.broadcast %12 : vector<1x128xf32> to vector<256x128xf32>
      %14 = arith.addf %11, %13 : vector<256x128xf32>
      %cst = arith.constant 0.000000e+00 : f32
      %15 = vector.broadcast %cst : f32 to vector<256x128xf32>
      %16 = arith.maximumf %14, %15 : vector<256x128xf32>
      %17 = arith.truncf %16 : vector<256x128xf32> to vector<256x128xbf16>
      %c0_6 = arith.constant 0 : index
      %c0_7 = arith.constant 0 : index
      %18 = vector.load %arg7[%c0_6, %c0_7] : memref<128x128xbf16, #tpu.memory_space<vmem>>, vector<128x128xbf16>
      %cst_8 = arith.constant dense<0.000000e+00> : vector<256x128xf32>
      %19 = tpu.matmul %17, %18, %cst_8 {dimension_numbers = #tpu.dot_dimension_numbers<[1], [0], [0], [1], [0, 0, 1, 1], [], []>} : vector<256x128xbf16>, vector<128x128xbf16>, vector<256x128xf32> -> vector<256x128xf32>
      %20 = arith.truncf %19 : vector<256x128xf32> to vector<256x128xbf16>
      %c0_9 = arith.constant 0 : index
      %c0_10 = arith.constant 0 : index
      %21 = vector.load %arg8[%c0_9, %c0_10] : memref<256x128xbf16, #tpu.memory_space<vmem>>, vector<256x128xbf16>
      tpu.vector_store %arg8[%c0_9, %c0_10], %20 {strides = array<i32>} : memref<256x128xbf16, #tpu.memory_space<vmem>>, vector<256x128xbf16>,
    } else {
    }
    return
  }
  func.func @transform_0(%arg0: i32, %arg1: i32, %arg2: memref<3x3xi32, #tpu.memory_space<smem>>, %arg3: memref<3xi32, #tpu.memory_space<smem>>) -> (i32, i32) {
    %0 = arith.index_cast %arg0 : i32 to index
    %1 = arith.index_cast %arg1 : i32 to index
    %2 = memref.load %arg2[%0, %1] : memref<3x3xi32, #tpu.memory_space<smem>>
    %c0_i32 = arith.constant 0 : i32
    return %arg0, %2 : i32, i32
  }
  func.func @transform_1(%arg0: i32, %arg1: i32, %arg2: memref<3x3xi32, #tpu.memory_space<smem>>, %arg3: memref<3xi32, #tpu.memory_space<smem>>) -> (i32, i32) {
    %c0_i32 = arith.constant 0 : i32
    %c0_i32_0 = arith.constant 0 : i32
    %c0_i32_1 = arith.constant 0 : i32
    return %c0_i32, %c0_i32_0 : i32, i32
  }
  func.func @transform_2(%arg0: i32, %arg1: i32, %arg2: memref<3x3xi32, #tpu.memory_space<smem>>, %arg3: memref<3xi32, #tpu.memory_space<smem>>) -> (i32, i32) {
    %c0_i32 = arith.constant 0 : i32
    %c0_i32_0 = arith.constant 0 : i32
    %c0_i32_1 = arith.constant 0 : i32
    return %c0_i32, %c0_i32_0 : i32, i32
  }
  func.func @transform_3(%arg0: i32, %arg1: i32, %arg2: memref<3x3xi32, #tpu.memory_space<smem>>, %arg3: memref<3xi32, #tpu.memory_space<smem>>) -> (i32, i32) {
    %c0_i32 = arith.constant 0 : i32
    %c0_i32_0 = arith.constant 0 : i32
    %c0_i32_1 = arith.constant 0 : i32
    return %c0_i32, %c0_i32_0 : i32, i32
  }
  func.func @transform_4(%arg0: i32, %arg1: i32, %arg2: memref<3x3xi32, #tpu.memory_space<smem>>, %arg3: memref<3xi32, #tpu.memory_space<smem>>) -> (i32, i32) {
    %c0_i32 = arith.constant 0 : i32
    %c0_i32_0 = arith.constant 0 : i32
    return %arg0, %c0_i32 : i32, i32
  }
}

module attributes {stable_mosaic.version = 11 : i64} {
  func.func @_conv2_pool_kernel(%arg0: i32, %arg1: i32, %arg2: memref<3x3xi32, #tpu.memory_space<smem>>, %arg3: memref<3xi32, #tpu.memory_space<smem>>, %arg4: memref<256x256xbf16, #tpu.memory_space<vmem>>, %arg5: memref<768x128xbf16, #tpu.memory_space<vmem>>, %arg6: memref<1x128xf32, #tpu.memory_space<vmem>>, %arg7: memref<8x256xbf16, #tpu.memory_space<vmem>>, %arg8: memref<1x8x128xf32, #tpu.memory_space<vmem>>, %arg9: memref<256x128xf32, #tpu.memory_space<vmem>>) attributes {dimension_semantics = [#tpu.dimension_semantics<parallel>, #tpu.dimension_semantics<arbitrary>], iteration_bounds = array<i64: 3, 3>, scalar_prefetch = 2 : i64, scratch_operands = 1 : i64, tpu.core_type = #tpu.core_type<tc>, window_params = [{transform_indices = @transform_0, window_bounds = array<i64: 256, 256>}, {pipeline_mode = #tpu.pipeline_mode<synchronous>, transform_indices = @transform_1, window_bounds = array<i64: 768, 128>}, {pipeline_mode = #tpu.pipeline_mode<synchronous>, transform_indices = @transform_2, window_bounds = array<i64: 1, 128>}, {transform_indices = @transform_3, window_bounds = array<i64: 8, 256>}, {transform_indices = @transform_4, window_bounds = array<i64: 1, 8, 128>}]} {
    %c0_i32 = arith.constant 0 : i32
    %0 = arith.cmpi eq, %arg1, %c0_i32 : i32
    %1 = arith.extui %0 : i1 to i32
    %c0_i32_0 = arith.constant 0 : i32
    %2 = arith.cmpi ne, %1, %c0_i32_0 : i32
    scf.if %2 {
      %cst = arith.constant 0.000000e+00 : f32
      %11 = vector.broadcast %cst : f32 to vector<256x128xf32>
      %c0 = arith.constant 0 : index
      %c0_3 = arith.constant 0 : index
      %12 = vector.load %arg9[%c0, %c0_3] : memref<256x128xf32, #tpu.memory_space<vmem>>, vector<256x128xf32>
      tpu.vector_store %arg9[%c0, %c0_3], %11 {strides = array<i32>} : memref<256x128xf32, #tpu.memory_space<vmem>>, vector<256x128xf32>,
    } else {
    }
    %3 = arith.index_cast %arg0 : i32 to index
    %4 = memref.load %arg3[%3] : memref<3xi32, #tpu.memory_space<smem>>
    %5 = arith.cmpi slt, %arg1, %4 : i32
    %6 = arith.extui %5 : i1 to i32
    %c0_i32_1 = arith.constant 0 : i32
    %7 = arith.cmpi ne, %6, %c0_i32_1 : i32
    scf.if %7 {
      %11 = arith.index_cast %arg0 : i32 to index
      %12 = arith.index_cast %arg1 : i32 to index
      %13 = memref.load %arg2[%11, %12] : memref<3x3xi32, #tpu.memory_space<smem>>
      %c256_i32 = arith.constant 256 : i32
      %14 = arith.muli %13, %c256_i32 : i32
      %15 = tpu.assume_multiple %14, 256 : i32
      %16 = arith.index_cast %15 : i32 to index
      %c0 = arith.constant 0 : index
      %17 = vector.load %arg5[%16, %c0] : memref<768x128xbf16, #tpu.memory_space<vmem>>, vector<256x128xbf16>
      %c0_3 = arith.constant 0 : index
      %c0_4 = arith.constant 0 : index
      %18 = vector.load %arg9[%c0_3, %c0_4] : memref<256x128xf32, #tpu.memory_space<vmem>>, vector<256x128xf32>
      %c0_5 = arith.constant 0 : index
      %c0_6 = arith.constant 0 : index
      %19 = vector.load %arg4[%c0_5, %c0_6] : memref<256x256xbf16, #tpu.memory_space<vmem>>, vector<256x256xbf16>
      %cst = arith.constant dense<0.000000e+00> : vector<256x128xf32>
      %20 = tpu.matmul %19, %17, %cst {dimension_numbers = #tpu.dot_dimension_numbers<[1], [0], [0], [1], [0, 0, 1, 1], [], []>} : vector<256x256xbf16>, vector<256x128xbf16>, vector<256x128xf32> -> vector<256x128xf32>
      %21 = arith.addf %18, %20 : vector<256x128xf32>
      %c0_7 = arith.constant 0 : index
      %c0_8 = arith.constant 0 : index
      %22 = vector.load %arg9[%c0_7, %c0_8] : memref<256x128xf32, #tpu.memory_space<vmem>>, vector<256x128xf32>
      tpu.vector_store %arg9[%c0_7, %c0_8], %21 {strides = array<i32>} : memref<256x128xf32, #tpu.memory_space<vmem>>, vector<256x128xf32>,
    } else {
    }
    %c2_i32 = arith.constant 2 : i32
    %8 = arith.cmpi eq, %arg1, %c2_i32 : i32
    %9 = arith.extui %8 : i1 to i32
    %c0_i32_2 = arith.constant 0 : i32
    %10 = arith.cmpi ne, %9, %c0_i32_2 : i32
    scf.if %10 {
      %c0 = arith.constant 0 : index
      %c0_3 = arith.constant 0 : index
      %11 = vector.load %arg9[%c0, %c0_3] : memref<256x128xf32, #tpu.memory_space<vmem>>, vector<256x128xf32>
      %c0_4 = arith.constant 0 : index
      %c0_5 = arith.constant 0 : index
      %12 = vector.load %arg6[%c0_4, %c0_5] : memref<1x128xf32, #tpu.memory_space<vmem>>, vector<1x128xf32>
      %13 = vector.broadcast %12 : vector<1x128xf32> to vector<256x128xf32>
      %14 = arith.addf %11, %13 : vector<256x128xf32>
      %cst = arith.constant 0.000000e+00 : f32
      %15 = vector.broadcast %cst : f32 to vector<256x128xf32>
      %16 = arith.maximumf %14, %15 : vector<256x128xf32>
      %c0_6 = arith.constant 0 : index
      %c0_7 = arith.constant 0 : index
      %17 = vector.load %arg7[%c0_6, %c0_7] : memref<8x256xbf16, #tpu.memory_space<vmem>>, vector<8x256xbf16>
      %18 = arith.truncf %16 : vector<256x128xf32> to vector<256x128xbf16>
      %cst_8 = arith.constant dense<0.000000e+00> : vector<8x128xf32>
      %19 = tpu.matmul %17, %18, %cst_8 {dimension_numbers = #tpu.dot_dimension_numbers<[1], [0], [0], [1], [0, 0, 1, 1], [], []>} : vector<8x256xbf16>, vector<256x128xbf16>, vector<8x128xf32> -> vector<8x128xf32>
      %c0_9 = arith.constant 0 : index
      %c0_10 = arith.constant 0 : index
      %c0_11 = arith.constant 0 : index
      %20 = vector.load %arg8[%c0_9, %c0_10, %c0_11] : memref<1x8x128xf32, #tpu.memory_space<vmem>>, vector<1x8x128xf32>
      %21 = vector.shape_cast %20 : vector<1x8x128xf32> to vector<8x128xf32>
      %22 = vector.shape_cast %19 : vector<8x128xf32> to vector<1x8x128xf32>
      tpu.vector_store %arg8[%c0_9, %c0_10, %c0_11], %22 {strides = array<i32>} : memref<1x8x128xf32, #tpu.memory_space<vmem>>, vector<1x8x128xf32>,
    } else {
    }
    return
  }
  func.func @transform_0(%arg0: i32, %arg1: i32, %arg2: memref<3x3xi32, #tpu.memory_space<smem>>, %arg3: memref<3xi32, #tpu.memory_space<smem>>) -> (i32, i32) {
    %0 = arith.index_cast %arg0 : i32 to index
    %1 = arith.index_cast %arg1 : i32 to index
    %2 = memref.load %arg2[%0, %1] : memref<3x3xi32, #tpu.memory_space<smem>>
    %c0_i32 = arith.constant 0 : i32
    return %arg0, %2 : i32, i32
  }
  func.func @transform_1(%arg0: i32, %arg1: i32, %arg2: memref<3x3xi32, #tpu.memory_space<smem>>, %arg3: memref<3xi32, #tpu.memory_space<smem>>) -> (i32, i32) {
    %c0_i32 = arith.constant 0 : i32
    %c0_i32_0 = arith.constant 0 : i32
    %c0_i32_1 = arith.constant 0 : i32
    return %c0_i32, %c0_i32_0 : i32, i32
  }
  func.func @transform_2(%arg0: i32, %arg1: i32, %arg2: memref<3x3xi32, #tpu.memory_space<smem>>, %arg3: memref<3xi32, #tpu.memory_space<smem>>) -> (i32, i32) {
    %c0_i32 = arith.constant 0 : i32
    %c0_i32_0 = arith.constant 0 : i32
    %c0_i32_1 = arith.constant 0 : i32
    return %c0_i32, %c0_i32_0 : i32, i32
  }
  func.func @transform_3(%arg0: i32, %arg1: i32, %arg2: memref<3x3xi32, #tpu.memory_space<smem>>, %arg3: memref<3xi32, #tpu.memory_space<smem>>) -> (i32, i32) {
    %c0_i32 = arith.constant 0 : i32
    %c0_i32_0 = arith.constant 0 : i32
    return %c0_i32, %arg0 : i32, i32
  }
  func.func @transform_4(%arg0: i32, %arg1: i32, %arg2: memref<3x3xi32, #tpu.memory_space<smem>>, %arg3: memref<3xi32, #tpu.memory_space<smem>>) -> (i32, i32, i32) {
    %c0_i32 = arith.constant 0 : i32
    %c0_i32_0 = arith.constant 0 : i32
    %c0_i32_1 = arith.constant 0 : i32
    return %arg0, %c0_i32, %c0_i32_0 : i32, i32, i32
  }
}

module attributes {stable_mosaic.version = 11 : i64} {
  func.func @_head_kernel(%arg0: i32, %arg1: memref<3x8x128xf32, #tpu.memory_space<vmem>>, %arg2: memref<128x128xbf16, #tpu.memory_space<vmem>>, %arg3: memref<1x128xf32, #tpu.memory_space<vmem>>, %arg4: memref<128x128xbf16, #tpu.memory_space<vmem>>, %arg5: memref<1x128xf32, #tpu.memory_space<vmem>>, %arg6: memref<8x128xf32, #tpu.memory_space<vmem>>) attributes {dimension_semantics = [#tpu.dimension_semantics<arbitrary>], iteration_bounds = array<i64: 1>, scalar_prefetch = 0 : i64, scratch_operands = 0 : i64, tpu.core_type = #tpu.core_type<tc>, window_params = [{pipeline_mode = #tpu.pipeline_mode<synchronous>, transform_indices = @transform_0, window_bounds = array<i64: 3, 8, 128>}, {pipeline_mode = #tpu.pipeline_mode<synchronous>, transform_indices = @transform_1, window_bounds = array<i64: 128, 128>}, {pipeline_mode = #tpu.pipeline_mode<synchronous>, transform_indices = @transform_2, window_bounds = array<i64: 1, 128>}, {pipeline_mode = #tpu.pipeline_mode<synchronous>, transform_indices = @transform_3, window_bounds = array<i64: 128, 128>}, {pipeline_mode = #tpu.pipeline_mode<synchronous>, transform_indices = @transform_4, window_bounds = array<i64: 1, 128>}, {pipeline_mode = #tpu.pipeline_mode<synchronous>, transform_indices = @transform_5, window_bounds = array<i64: 8, 128>}]} {
    %c0 = arith.constant 0 : index
    %c0_0 = arith.constant 0 : index
    %c0_1 = arith.constant 0 : index
    %0 = vector.load %arg1[%c0, %c0_0, %c0_1] : memref<3x8x128xf32, #tpu.memory_space<vmem>>, vector<3x8x128xf32>
    %cst = arith.constant dense<0.000000e+00> : vector<8x128xf32>
    %1 = vector.multi_reduction <add>, %0, %cst [0] : vector<3x8x128xf32> to vector<8x128xf32>
    %2 = arith.truncf %1 : vector<8x128xf32> to vector<8x128xbf16>
    %c0_2 = arith.constant 0 : index
    %c0_3 = arith.constant 0 : index
    %3 = vector.load %arg2[%c0_2, %c0_3] : memref<128x128xbf16, #tpu.memory_space<vmem>>, vector<128x128xbf16>
    %cst_4 = arith.constant dense<0.000000e+00> : vector<8x128xf32>
    %4 = tpu.matmul %2, %3, %cst_4 {dimension_numbers = #tpu.dot_dimension_numbers<[1], [0], [0], [1], [0, 0, 1, 1], [], []>} : vector<8x128xbf16>, vector<128x128xbf16>, vector<8x128xf32> -> vector<8x128xf32>
    %c0_5 = arith.constant 0 : index
    %c0_6 = arith.constant 0 : index
    %5 = vector.load %arg3[%c0_5, %c0_6] : memref<1x128xf32, #tpu.memory_space<vmem>>, vector<1x128xf32>
    %6 = vector.broadcast %5 : vector<1x128xf32> to vector<8x128xf32>
    %7 = arith.addf %4, %6 : vector<8x128xf32>
    %8 = arith.truncf %7 : vector<8x128xf32> to vector<8x128xbf16>
    %c0_7 = arith.constant 0 : index
    %c0_8 = arith.constant 0 : index
    %9 = vector.load %arg4[%c0_7, %c0_8] : memref<128x128xbf16, #tpu.memory_space<vmem>>, vector<128x128xbf16>
    %cst_9 = arith.constant dense<0.000000e+00> : vector<8x128xf32>
    %10 = tpu.matmul %8, %9, %cst_9 {dimension_numbers = #tpu.dot_dimension_numbers<[1], [0], [0], [1], [0, 0, 1, 1], [], []>} : vector<8x128xbf16>, vector<128x128xbf16>, vector<8x128xf32> -> vector<8x128xf32>
    %c0_10 = arith.constant 0 : index
    %c0_11 = arith.constant 0 : index
    %11 = vector.load %arg5[%c0_10, %c0_11] : memref<1x128xf32, #tpu.memory_space<vmem>>, vector<1x128xf32>
    %12 = vector.broadcast %11 : vector<1x128xf32> to vector<8x128xf32>
    %13 = arith.addf %10, %12 : vector<8x128xf32>
    %14 = tpu.iota {dimensions = array<i32: 1>} : vector<8x128xi32>
    %c4_i32 = arith.constant 4 : i32
    %15 = vector.broadcast %c4_i32 : i32 to vector<8x128xi32>
    %16 = arith.cmpi slt, %14, %15 : vector<8x128xi32>
    %cst_12 = arith.constant -1.000000e+30 : f32
    %17 = vector.broadcast %cst_12 : f32 to vector<8x128xf32>
    %18 = arith.select %16, %13, %17 : vector<8x128xi1>, vector<8x128xf32>
    %cst_13 = arith.constant dense<0xFF800000> : vector<8xf32>
    %19 = vector.multi_reduction <maximumf>, %18, %cst_13 [1] : vector<8x128xf32> to vector<8xf32>
    %20 = vector.shape_cast %19 : vector<8xf32> to vector<8x1xf32>
    %21 = vector.broadcast %20 : vector<8x1xf32> to vector<8x128xf32>
    %22 = arith.subf %18, %21 : vector<8x128xf32>
    %23 = math.exp %22 : vector<8x128xf32>
    %cst_14 = arith.constant dense<0.000000e+00> : vector<8xf32>
    %24 = vector.multi_reduction <add>, %23, %cst_14 [1] : vector<8x128xf32> to vector<8xf32>
    %25 = vector.shape_cast %24 : vector<8xf32> to vector<8x1xf32>
    %26 = math.log %25 : vector<8x1xf32>
    %27 = vector.broadcast %26 : vector<8x1xf32> to vector<8x128xf32>
    %28 = arith.subf %22, %27 : vector<8x128xf32>
    %c0_15 = arith.constant 0 : index
    %c0_16 = arith.constant 0 : index
    %29 = vector.load %arg6[%c0_15, %c0_16] : memref<8x128xf32, #tpu.memory_space<vmem>>, vector<8x128xf32>
    tpu.vector_store %arg6[%c0_15, %c0_16], %28 {strides = array<i32>} : memref<8x128xf32, #tpu.memory_space<vmem>>, vector<8x128xf32>,
    return
  }
  func.func @transform_0(%arg0: i32) -> (i32, i32, i32) {
    %c0_i32 = arith.constant 0 : i32
    %c0_i32_0 = arith.constant 0 : i32
    %c0_i32_1 = arith.constant 0 : i32
    %c0_i32_2 = arith.constant 0 : i32
    return %c0_i32, %c0_i32_0, %c0_i32_1 : i32, i32, i32
  }
  func.func @transform_1(%arg0: i32) -> (i32, i32) {
    %c0_i32 = arith.constant 0 : i32
    %c0_i32_0 = arith.constant 0 : i32
    %c0_i32_1 = arith.constant 0 : i32
    return %c0_i32, %c0_i32_0 : i32, i32
  }
  func.func @transform_2(%arg0: i32) -> (i32, i32) {
    %c0_i32 = arith.constant 0 : i32
    %c0_i32_0 = arith.constant 0 : i32
    %c0_i32_1 = arith.constant 0 : i32
    return %c0_i32, %c0_i32_0 : i32, i32
  }
  func.func @transform_3(%arg0: i32) -> (i32, i32) {
    %c0_i32 = arith.constant 0 : i32
    %c0_i32_0 = arith.constant 0 : i32
    %c0_i32_1 = arith.constant 0 : i32
    return %c0_i32, %c0_i32_0 : i32, i32
  }
  func.func @transform_4(%arg0: i32) -> (i32, i32) {
    %c0_i32 = arith.constant 0 : i32
    %c0_i32_0 = arith.constant 0 : i32
    %c0_i32_1 = arith.constant 0 : i32
    return %c0_i32, %c0_i32_0 : i32, i32
  }
  func.func @transform_5(%arg0: i32) -> (i32, i32) {
    %c0_i32 = arith.constant 0 : i32
    %c0_i32_0 = arith.constant 0 : i32
    %c0_i32_1 = arith.constant 0 : i32
    return %c0_i32, %c0_i32_0 : i32, i32
  }
}

</mosaic_0001>

<bundles_post_ra>
// kernel: _gcn2mlp2_jit.3
= control target key start
LH: loop header
LB: loop body
LE: loop exit
PB: predicated region body
PF: predicated region fallthrough
CT: control target
= control target key end

     0   :  { %s2655_s0 = inlined_call_operand.vmem [shape: s32[3,3], index: 0, kind: input, shape index: {}]   ;;  %s2656_s2 = inlined_call_operand.vmem [shape: bf16[768,768], index: 2, kind: input, shape index: {}]   ;;  %s2657_s3 = inlined_call_operand.vmem [shape: bf16[768,128], index: 3, kind: input, shape index: {}]   ;;  %s2658_s4 = inlined_call_operand.vmem [shape: f32[1,128], index: 4, kind: input, shape index: {}]   ;;  %s2659_s5 = inlined_call_operand.vmem [shape: bf16[128,128], index: 5, kind: input, shape index: {}]   ;;  %s2660_s6 = inlined_call_operand.vmem [shape: bf16[768,128], index: 6, kind: output, shape index: {}]   ;;  %s2661_s1 = inlined_call_operand.vmem [shape: s32[3], index: 1, kind: input, shape index: {}]  }
   0x1   :  { %s11_s23 = sshll.u32 %s2655_s0, 4  ;;  %s15_s26 = sshll.u32 %s2661_s1, 4  ;;  %s12_s23 = int_to_ptr.vmem [resolvable:$true] %s11_s23  ;;  %s16_s26 = int_to_ptr.vmem [resolvable:$true] %s15_s26 }
   0x2   :  { %s2229_s27 = scalar_lea.vmem %s12_s23, 64  ;;  %p2234_p1 = scmp.lt.s32.totalorder %s12_s23, %s12_s23 }
   0x3   :  { %p2230_p0 = scmp.ne.s32.totalorder %s12_s23, %s2229_s27  ;;  %p2235_p2 = scmp.lt.s32.totalorder %s2229_s27, %s2229_s27 }
   0x5   :  { %p2236_p3 = por %p2235_p2, %p2234_p1 }
   0x7   :  { %p2237_p4 = pnand %p2236_p3, %p2230_p0 }
   0x9   :  { %2240 = shalt.err (!%p2237_p4)  }
   0xa   :  { %s2311_s28 = smov [#allocation4]   ;;  %s2241_s29 = scalar_lea.vmem %s16_s26, 16 }
   0xb   :  { %14 = dma.vmem_to_smem %s12_s23, 64, %s2311_s28, [#allocation3] }
   0xc   :  { %p2242_p5 = scmp.ne.s32.totalorder %s16_s26, %s2241_s29  ;;  %p2246_p6 = scmp.lt.s32.totalorder %s16_s26, %s16_s26 }
   0xd   :  { %p2247_p7 = scmp.lt.s32.totalorder %s2241_s29, %s2241_s29 }
   0xf   :  { %p2248_p8 = por %p2247_p7, %p2246_p6 }
  0x11   :  { %p2249_p9 = pnand %p2248_p8, %p2242_p5 }
  0x13   :  { %2252 = shalt.err (!%p2249_p9)  }
  0x14   :  { %s2312_s0 = smov [#allocation5]  }
  0x15   :  { %18 = dma.vmem_to_smem %s16_s26, 16, %s2312_s0, [#allocation3] }
  0x16   :  { %2281 = dma.done.wait [#allocation3], 80 }
  0x17   :  { %2282 = vsyncadd [#allocation3], 4294967216 }
  0x18   :  { %20 = sfence }
  0x19   :  { %s2355_s1 = smov 0   ;;  %s2357_s30 = smov 0  }
  0x1a   :  { %s2359_s7 = smov 0   ;;  %s2361_s8 = smov 0  }
  0x1b   :  { %s2363_s9 = smov 0   ;;  %s2365_s10 = smov 0  }
  0x1c   :  { %s2367_s11 = smov 0  }
  0x1d LB: > { %s35_s12 = sadd.s32 1, %s2301_s9  ;;  %s38_s13 = sadd.s32 1, %s2305_s10  ;;  %s2309_s11 = sphi %s2367_s11, %s26_s11   ;;  %s2305_s10 = sphi %s2365_s10, %s2667_s10   ;;  %s2301_s9 = sphi %s2363_s9, %s2666_s9   ;;  %s2297_s8 = sphi %s2361_s8, %s2665_s8   ;;  %s2293_s7 = sphi %s2359_s7, %s2664_s7   ;;  %s2289_s30 = sphi %s2357_s30, %s2663_s30   ;;  %s2285_s1 = sphi %s2355_s1, %s2662_s1  }
  0x1e   : > { %p36_p10 = scmp.ge.s32.totalorder %s35_s12, 3  ;;  %s42_s14 = sshra.s32 %s2301_s9, 7 }
  0x1f   : > { %s44_s15 = sadd.s32 %s2305_s10, %s42_s14  ;;  %s47_s16 = sand.u32 127, %s2301_s9 }
  0x20   : > { %s2669_s12 = smov (%p36_p10, %s35_s12), 0  ;;  %s2671_s13 = smov (!%p36_p10, %s38_s13), %s2305_s10 }
  0x21   : > { %s1643_s17 = sshll.u32 %s44_s15, 7  ;;  %p40_p11 = scmp.ge.s32.totalorder %s2671_s13, 3 }
  0x22   : > { %s48_s18 = sadd.s32 %s1643_s17, %s47_s16  ;;  %s50_s19 = sshra.s32 %s2669_s12, 7 }
  0x23   : > { %s2673_s13 = smov (%p40_p11, %s2671_s13), 0  ;;  %s55_s20 = sand.u32 127, %s2669_s12 }
  0x24   : > { %p70_p12 = scmp.ne.s32.totalorder %s2289_s30, %s2285_s1  ;;  %s49_s21 = sld [smem:[#allocation4 + %s48_s18]] }
  0x25   : > { %s52_s22 = sadd.s32 %s50_s19, %s2673_s13  ;;  %p71_p13 = scmp.eq.s32.totalorder %s2309_s11, 0 }
  0x26   : > { %s1644_s23 = sshll.u32 %s52_s22, 7  ;;  %s58_s26 = ssub.s32 %s2305_s10, %s2673_s13 }
  0x27   : > { %s56_s24 = sadd.s32 %s1644_s23, %s55_s20  ;;  %p72_p0 = por %p71_p13, %p70_p12 }
  0x28   : > { %s57_s25 = sld [smem:[#allocation4 + %s56_s24]]  ;;  %s63_s29 = sadd.s32 1, %s2289_s30 }
  0x29   : > { %p1646_p2 = scmp.ge.s32.totalorder %s2309_s11, 9 }
  0x2e   : > { %s59_s27 = ssub.s32 %s49_s21, %s57_s25  ;;  %194 = sbr.rel (%p1646_p2) target bundleno = 78 (0x4e), region = 28 }
  0x2f   : > { %s60_s28 = sor.u32 %s59_s27, %s58_s26 }
  0x30   : > { %p61_p1 = scmp.eq.s32.totalorder %s60_s28, 0 }
  0x32   : > { %s2410_s0 = scalar_select %p61_p1, %s2289_s30, %s63_s29  }
  0x33   : > { %197 = sbr.rel (!%p72_p0) target bundleno = 78 (0x4e), region = 32  ;;  %s209_s14 = sld [smem:[#allocation4 + %s48_s18]] (%p72_p0) }
  0x34   : > { %s199_s15 = sand.u32 (%p72_p0), 1, %s2289_s30   ;;  %s2097_s16 = smul.u32 (%p72_p0), 192, %s2305_s10 }
  0x35   : > { %s1647_s17 = sshll.u32 (%p72_p0), %s199_s15, 8 }
  0x36   : > { %s2423_s18 = scalar_lea.vmem (%p72_p0), [#allocation6], %s1647_s17 }
  0x39   : > { %s1650_s19 = sshll.u32 %s209_s14, 1 }
  0x3a   : > { %s213_s20 = sadd.s32 %s2097_s16, %s1650_s19 }
  0x3b   : > { %s1652_s22 = sshll.u32 %s213_s20, 2 }
  0x3c   : > { %s2418_s24 = scalar_lea.vmem %s2656_s2, %s1652_s22 }
  0x3d   : > { %v306_v0 = vld [vmem:[%s2418_s24] sm:$0xff]  ;;  %v308_v1 = vld [vmem:[%s2418_s24 + $0x18] sm:$0xff]  ;;  %v310_v2 = vld [vmem:[%s2418_s24 + $0x30] sm:$0xff] }
  0x3e   : > { %307 = vst [vmem:[%s2423_s18] sm:$0xff] %v306_v0  ;;  %309 = vst [vmem:[%s2423_s18 + $0x8] sm:$0xff] %v308_v1  ;;  %v312_v3 = vld [vmem:[%s2418_s24 + $0x48] sm:$0xff]  ;;  %v314_v4 = vld [vmem:[%s2418_s24 + $0x60] sm:$0xff] }
  0x3f   : > { %311 = vst [vmem:[%s2423_s18 + $0x10] sm:$0xff] %v310_v2  ;;  %v316_v5 = vld [vmem:[%s2418_s24 + $0x78] sm:$0xff]  ;;  %313 = vst [vmem:[%s2423_s18 + $0x18] sm:$0xff] %v312_v3  ;;  %v318_v6 = vld [vmem:[%s2418_s24 + $0x90] sm:$0xff] }
  0x40   : > { %315 = vst [vmem:[%s2423_s18 + $0x20] sm:$0xff] %v314_v4  ;;  %317 = vst [vmem:[%s2423_s18 + $0x28] sm:$0xff] %v316_v5  ;;  %v320_v7 = vld [vmem:[%s2418_s24 + $0xa8] sm:$0xff]  ;;  %v322_v8 = vld [vmem:[%s2418_s24 + $0xc0] sm:$0xff] }
  0x41   : > { %319 = vst [vmem:[%s2423_s18 + $0x30] sm:$0xff] %v318_v6  ;;  %321 = vst [vmem:[%s2423_s18 + $0x38] sm:$0xff] %v320_v7  ;;  %v324_v9 = vld [vmem:[%s2418_s24 + $0xd8] sm:$0xff]  ;;  %v326_v10 = vld [vmem:[%s2418_s24 + $0xf0] sm:$0xff] }
  0x42   : > { %323 = vst [vmem:[%s2423_s18 + $0x40] sm:$0xff] %v322_v8  ;;  %v328_v11 = vld [vmem:[%s2418_s24 + $0x108] sm:$0xff]  ;;  %325 = vst [vmem:[%s2423_s18 + $0x48] sm:$0xff] %v324_v9  ;;  %v330_v12 = vld [vmem:[%s2418_s24 + $0x120] sm:$0xff] }
  0x43   : > { %327 = vst [vmem:[%s2423_s18 + $0x50] sm:$0xff] %v326_v10  ;;  %329 = vst [vmem:[%s2423_s18 + $0x58] sm:$0xff] %v328_v11  ;;  %v332_v13 = vld [vmem:[%s2418_s24 + $0x138] sm:$0xff]  ;;  %v334_v14 = vld [vmem:[%s2418_s24 + $0x150] sm:$0xff] }
  0x44   : > { %331 = vst [vmem:[%s2423_s18 + $0x60] sm:$0xff] %v330_v12  ;;  %333 = vst [vmem:[%s2423_s18 + $0x68] sm:$0xff] %v332_v13  ;;  %v336_v15 = vld [vmem:[%s2418_s24 + $0x168] sm:$0xff]  ;;  %v338_v16 = vld [vmem:[%s2418_s24 + $0x180] sm:$0xff] }
  0x45   : > { %335 = vst [vmem:[%s2423_s18 + $0x70] sm:$0xff] %v334_v14  ;;  %v340_v17 = vld [vmem:[%s2418_s24 + $0x198] sm:$0xff]  ;;  %337 = vst [vmem:[%s2423_s18 + $0x78] sm:$0xff] %v336_v15  ;;  %v342_v18 = vld [vmem:[%s2418_s24 + $0x1b0] sm:$0xff] }
  0x46   : > { %339 = vst [vmem:[%s2423_s18 + $0x80] sm:$0xff] %v338_v16  ;;  %341 = vst [vmem:[%s2423_s18 + $0x88] sm:$0xff] %v340_v17  ;;  %v344_v19 = vld [vmem:[%s2418_s24 + $0x1c8] sm:$0xff]  ;;  %v346_v20 = vld [vmem:[%s2418_s24 + $0x1e0] sm:$0xff] }
  0x47   : > { %343 = vst [vmem:[%s2423_s18 + $0x90] sm:$0xff] %v342_v18  ;;  %345 = vst [vmem:[%s2423_s18 + $0x98] sm:$0xff] %v344_v19  ;;  %v348_v21 = vld [vmem:[%s2418_s24 + $0x1f8] sm:$0xff]  ;;  %v350_v22 = vld [vmem:[%s2418_s24 + $0x210] sm:$0xff] }
  0x48   : > { %347 = vst [vmem:[%s2423_s18 + $0xa0] sm:$0xff] %v346_v20  ;;  %v352_v23 = vld [vmem:[%s2418_s24 + $0x228] sm:$0xff]  ;;  %349 = vst [vmem:[%s2423_s18 + $0xa8] sm:$0xff] %v348_v21  ;;  %v354_v24 = vld [vmem:[%s2418_s24 + $0x240] sm:$0xff] }
  0x49   : > { %351 = vst [vmem:[%s2423_s18 + $0xb0] sm:$0xff] %v350_v22  ;;  %353 = vst [vmem:[%s2423_s18 + $0xb8] sm:$0xff] %v352_v23  ;;  %v356_v25 = vld [vmem:[%s2418_s24 + $0x258] sm:$0xff]  ;;  %v358_v26 = vld [vmem:[%s2418_s24 + $0x270] sm:$0xff] }
  0x4a   : > { %355 = vst [vmem:[%s2423_s18 + $0xc0] sm:$0xff] %v354_v24  ;;  %357 = vst [vmem:[%s2423_s18 + $0xc8] sm:$0xff] %v356_v25  ;;  %v360_v27 = vld [vmem:[%s2418_s24 + $0x288] sm:$0xff]  ;;  %v362_v28 = vld [vmem:[%s2418_s24 + $0x2a0] sm:$0xff] }
  0x4b   : > { %359 = vst [vmem:[%s2423_s18 + $0xd0] sm:$0xff] %v358_v26  ;;  %v364_v29 = vld [vmem:[%s2418_s24 + $0x2b8] sm:$0xff]  ;;  %361 = vst [vmem:[%s2423_s18 + $0xd8] sm:$0xff] %v360_v27  ;;  %v366_v30 = vld [vmem:[%s2418_s24 + $0x2d0] sm:$0xff] }
  0x4c   : > { %363 = vst [vmem:[%s2423_s18 + $0xe0] sm:$0xff] %v362_v28  ;;  %365 = vst [vmem:[%s2423_s18 + $0xe8] sm:$0xff] %v364_v29  ;;  %v368_v31 = vld [vmem:[%s2418_s24 + $0x2e8] sm:$0xff] }
  0x4d   : > { %367 = vst [vmem:[%s2423_s18 + $0xf0] sm:$0xff] %v366_v30  ;;  %369 = vst [vmem:[%s2423_s18 + $0xf8] sm:$0xff] %v368_v31 }
  0x4e PF: > { %p1653_p3 = scmp.ge.s32.totalorder %s2309_s11, 1  ;;  %p374_p4 = scmp.lt.s32.totalorder %s2309_s11, 10 }
  0x50   : > { %p375_p5 = pnand %p1653_p3, %p374_p4 }
  0x51   : > { %s381_s25 = sand.u32 (!%p375_p5), 1, %s2285_s1   ;;  %s1655_s26 = sshll.u32 (!%p375_p5), %s2297_s8, 5 }
  0x52   : > { %378 = sbr.rel (%p375_p5) target bundleno = 689 (0x2b1), region = 70  ;;  %s1654_s27 = sshll.u32 (!%p375_p5), %s381_s25, 8 }
  0x53   : > { %p417_p6 = scmp.lt.s32.totalorder (!%p375_p5), %s1655_s26, 95  ;;  %s2495_s16 = scalar_lea.vmem (!%p375_p5), [#allocation6], %s1654_s27 }
  0x54   : > { %p1657_p7 = scmp.ne.s32.totalorder (!%p375_p5), %s2293_s7, 0 }
  0x57   : > { %s2675_s26 = smov (!%p417_p6, %s1655_s26), 95  ;;  %426 = sbr.rel (%p1657_p7) target bundleno = 109 (0x6d), region = 78 }
  0x58   : > { %s1656_s28 = sshll.u32 %s2675_s26, 2 }
  0x59   : > { %s2493_s15 = scalar_lea.vmem %s2660_s6, %s1656_s28 }
  0x5c   : > { %v2313_v32 = vmov 0.0  }
  0x5d   : > { %427 = vst [vmem:[#allocation2 + $0xb0] sm:$0xff] %v2313_v32  ;;  %428 = vst [vmem:[#allocation2] sm:$0xff] %v2313_v32 }
  0x5e   : > { %429 = vst [vmem:[#allocation2 + $0xd8] sm:$0xff] %v2313_v32  ;;  %430 = vst [vmem:[#allocation2 + $0x18] sm:$0xff] %v2313_v32 }
  0x5f   : > { %431 = vst [vmem:[#allocation2 + $0x50] sm:$0xff] %v2313_v32  ;;  %432 = vst [vmem:[#allocation2 + $0x68] sm:$0xff] %v2313_v32 }
  0x60   : > { %433 = vst [vmem:[#allocation2 + $0x30] sm:$0xff] %v2313_v32  ;;  %434 = vst [vmem:[#allocation2 + $0x48] sm:$0xff] %v2313_v32 }
  0x61   : > { %435 = vst [vmem:[#allocation2 + $0x80] sm:$0xff] %v2313_v32  ;;  %436 = vst [vmem:[#allocation2 + $0x88] sm:$0xff] %v2313_v32 }
  0x62   : > { %437 = vst [vmem:[#allocation2 + $0xe8] sm:$0xff] %v2313_v32  ;;  %438 = vst [vmem:[#allocation2 + $0xb8] sm:$0xff] %v2313_v32 }
  0x63   : > { %439 = vst [vmem:[#allocation2 + $0x60] sm:$0xff] %v2313_v32  ;;  %440 = vst [vmem:[#allocation2 + $0xf0] sm:$0xff] %v2313_v32 }
  0x64   : > { %441 = vst [vmem:[#allocation2 + $0x8] sm:$0xff] %v2313_v32  ;;  %442 = vst [vmem:[#allocation2 + $0x78] sm:$0xff] %v2313_v32 }
  0x65   : > { %443 = vst [vmem:[#allocation2 + $0x38] sm:$0xff] %v2313_v32  ;;  %444 = vst [vmem:[#allocation2 + $0x58] sm:$0xff] %v2313_v32 }
  0x66   : > { %445 = vst [vmem:[#allocation2 + $0x40] sm:$0xff] %v2313_v32  ;;  %446 = vst [vmem:[#allocation2 + $0xc8] sm:$0xff] %v2313_v32 }
  0x67   : > { %447 = vst [vmem:[#allocation2 + $0xe0] sm:$0xff] %v2313_v32  ;;  %448 = vst [vmem:[#allocation2 + $0x90] sm:$0xff] %v2313_v32 }
  0x68   : > { %449 = vst [vmem:[#allocation2 + $0x70] sm:$0xff] %v2313_v32  ;;  %450 = vst [vmem:[#allocation2 + $0xc0] sm:$0xff] %v2313_v32 }
  0x69   : > { %451 = vst [vmem:[#allocation2 + $0xa8] sm:$0xff] %v2313_v32  ;;  %452 = vst [vmem:[#allocation2 + $0xd0] sm:$0xff] %v2313_v32 }
  0x6a   : > { %453 = vst [vmem:[#allocation2 + $0x10] sm:$0xff] %v2313_v32  ;;  %454 = vst [vmem:[#allocation2 + $0x28] sm:$0xff] %v2313_v32 }
  0x6b   : > { %455 = vst [vmem:[#allocation2 + $0xa0] sm:$0xff] %v2313_v32  ;;  %456 = vst [vmem:[#allocation2 + $0xf8] sm:$0xff] %v2313_v32 }
  0x6c   : > { %457 = vst [vmem:[#allocation2 + $0x20] sm:$0xff] %v2313_v32  ;;  %458 = vst [vmem:[#allocation2 + $0x98] sm:$0xff] %v2313_v32 }
  0x6d PF: > { %s459_s1 = sld [smem:[#allocation5 + %s2297_s8]] }
  0x73   : > { %p1658_p8 = scmp.ge.s32.totalorder %s2293_s7, %s459_s1 }
  0x74   : > { %s464_s17 = sshra.s32 (!%p1658_p8), %s2293_s7, 7  ;;  %s469_s19 = sand.u32 (!%p1658_p8), 127, %s2293_s7 }
  0x75   : > { %463 = sbr.rel (%p1658_p8) target bundleno = 423 (0x1a7), region = 82  ;;  %s466_s20 = sadd.s32 (!%p1658_p8), %s2297_s8, %s464_s17 }
  0x76   : > { %s1659_s22 = sshll.u32 (!%p1658_p8), %s466_s20, 7 }
  0x77   : > { %s470_s23 = sadd.s32 (!%p1658_p8), %s1659_s22, %s469_s19 }
  0x78   : > { %s471_s21 = sld [smem:[#allocation4 + %s470_s23]] (!%p1658_p8) }
  0x7a   : > { %v2175_v33 = vld [vmem:[%s2495_s16 + $0x4] ss:$8 sps:$4 sm:$0xff]   ;;  %v2173_v51 = vld [vmem:[%s2495_s16] ss:$8 sps:$4 sm:$0xff]   ;;  %v2179_v53 = vld [vmem:[%s2495_s16 + $0x14] ss:$8 sps:$4 sm:$0xff]  }
  0x7b   : > { %v2178_v34 = vld [vmem:[%s2495_s16 + $0x84] ss:$8 sps:$4 sm:$0xff]   ;;  %861 = vmatprep.mubr.bf16.mxu0 %v2175_v33  ;;  %v2176_v52 = vld [vmem:[%s2495_s16 + $0x80] ss:$8 sps:$4 sm:$0xff]   ;;  %v2181_v54 = vld [vmem:[%s2495_s16 + $0x94] ss:$8 sps:$4 sm:$0xff]  }
  0x7c   : > { %925 = vmatprep.mubr.bf16.mxu1 %v2178_v34  ;;  %v2183_v55 = vld [vmem:[%s2495_s16 + $0x10] ss:$8 sps:$4 sm:$0xff]   ;;  %v2185_v57 = vld [vmem:[%s2495_s16 + $0x24] ss:$8 sps:$4 sm:$0xff]   ;;  %v2189_v59 = vld [vmem:[%s2495_s16 + $0x20] ss:$8 sps:$4 sm:$0xff]  }
  0x7d   : > { %v2184_v56 = vld [vmem:[%s2495_s16 + $0x90] ss:$8 sps:$4 sm:$0xff]   ;;  %v2187_v58 = vld [vmem:[%s2495_s16 + $0xa4] ss:$8 sps:$4 sm:$0xff]   ;;  %v2190_v60 = vld [vmem:[%s2495_s16 + $0xa0] ss:$8 sps:$4 sm:$0xff]  }
  0x7e   : > { %s1660_s24 = sshll.u32 %s471_s21, 8  ;;  %v2191_v61 = vld [vmem:[%s2495_s16 + $0x34] ss:$8 sps:$4 sm:$0xff]   ;;  %v2195_v63 = vld [vmem:[%s2495_s16 + $0x30] ss:$8 sps:$4 sm:$0xff]   ;;  %v510_v29 = vld [vmem:[#allocation2] sm:$0xff] }
  0x7f   : > { %s473_s18 = sshra.s32 %s1660_s24, 3  ;;  %v2193_v62 = vld [vmem:[%s2495_s16 + $0xb4] ss:$8 sps:$4 sm:$0xff]   ;;  %v2196_v0 = vld [vmem:[%s2495_s16 + $0xb0] ss:$8 sps:$4 sm:$0xff]  }
  0x80   : > { %s1661_s25 = sshll.u32 %s473_s18, 2  ;;  %v2197_v1 = vld [vmem:[%s2495_s16 + $0x44] ss:$8 sps:$4 sm:$0xff]   ;;  %v2201_v3 = vld [vmem:[%s2495_s16 + $0x40] ss:$8 sps:$4 sm:$0xff]   ;;  %v509_v19 = vld [vmem:[#allocation2 + $0xb0] sm:$0xff] }
  0x81   : > { %s2508_s28 = scalar_lea.vmem %s2657_s3, %s1661_s25  ;;  %v2199_v2 = vld [vmem:[%s2495_s16 + $0xc4] ss:$8 sps:$4 sm:$0xff]   ;;  %v2202_v4 = vld [vmem:[%s2495_s16 + $0xc0] ss:$8 sps:$4 sm:$0xff]   ;;  %v2203_v5 = vld [vmem:[%s2495_s16 + $0x54] ss:$8 sps:$4 sm:$0xff]  }
  0x82   : > { %v2157_v35 = vld [vmem:[%s2508_s28 + $0x78] sm:$0xff]   ;;  %v2159_v37 = vld [vmem:[%s2508_s28 + $0x70] sm:$0xff]   ;;  %v2161_v39 = vld [vmem:[%s2508_s28 + $0x68] sm:$0xff]  }
  0x83   : > { %v2158_v36 = vld [vmem:[%s2508_s28 + $0x38] sm:$0xff]   ;;  %1881 = vmatprep.subr.bf16.mxu0 %v2157_v35  ;;  %2065 = vmatprep.subr.bf16.mxu1 %v2157_v35  ;;  %v2160_v38 = vld [vmem:[%s2508_s28 + $0x30] sm:$0xff]   ;;  %v2162_v40 = vld [vmem:[%s2508_s28 + $0x28] sm:$0xff]  }
  0x84   : > { %1882 = vmatpush3.bf16.msra.mxu0 %v2158_v36  ;;  %2073 = vmatpush3.bf16.msra.mxu1 %v2158_v36  ;;  %v2163_v41 = vld [vmem:[%s2508_s28 + $0x60] sm:$0xff]   ;;  %v2165_v43 = vld [vmem:[%s2508_s28 + $0x58] sm:$0xff]   ;;  %v2167_v45 = vld [vmem:[%s2508_s28 + $0x50] sm:$0xff]  }
  0x85   : > { %1883 = vmatprep.subr.bf16.mxu0 %v2159_v37  ;;  %2066 = vmatprep.subr.bf16.mxu1 %v2159_v37  ;;  %v2164_v42 = vld [vmem:[%s2508_s28 + $0x20] sm:$0xff]   ;;  %v2166_v44 = vld [vmem:[%s2508_s28 + $0x18] sm:$0xff]   ;;  %v2168_v46 = vld [vmem:[%s2508_s28 + $0x10] sm:$0xff]  }
  0x86   : > { %v2169_v47 = vld [vmem:[%s2508_s28 + $0x48] sm:$0xff]   ;;  %v2171_v49 = vld [vmem:[%s2508_s28 + $0x40] sm:$0xff]   ;;  %v2205_v6 = vld [vmem:[%s2495_s16 + $0xd4] ss:$8 sps:$4 sm:$0xff]  }
  0x87   : > { %v2170_v48 = vld [vmem:[%s2508_s28 + $0x8] sm:$0xff]   ;;  %v2172_v50 = vld [vmem:[%s2508_s28] sm:$0xff]   ;;  %v2207_v7 = vld [vmem:[%s2495_s16 + $0x50] ss:$8 sps:$4 sm:$0xff]  }
  0x88   : > { %1884 = vmatpush3.bf16.msra.mxu0 %v2160_v38  ;;  %2074 = vmatpush3.bf16.msra.mxu1 %v2160_v38  ;;  %v2208_v8 = vld [vmem:[%s2495_s16 + $0xd0] ss:$8 sps:$4 sm:$0xff]   ;;  %v2209_v9 = vld [vmem:[%s2495_s16 + $0x64] ss:$8 sps:$4 sm:$0xff]   ;;  %v2213_v11 = vld [vmem:[%s2495_s16 + $0x60] ss:$8 sps:$4 sm:$0xff]  }
  0x89   : > { %1885 = vmatprep.subr.bf16.mxu0 %v2161_v39  ;;  %2067 = vmatprep.subr.bf16.mxu1 %v2161_v39  ;;  %v2211_v10 = vld [vmem:[%s2495_s16 + $0xe4] ss:$8 sps:$4 sm:$0xff]   ;;  %v2214_v12 = vld [vmem:[%s2495_s16 + $0xe0] ss:$8 sps:$4 sm:$0xff]   ;;  %v2215_v13 = vld [vmem:[%s2495_s16 + $0x74] ss:$8 sps:$4 sm:$0xff]  }
  0x8a   : > { %v2217_v14 = vld [vmem:[%s2495_s16 + $0xf4] ss:$8 sps:$4 sm:$0xff]   ;;  %v2219_v15 = vld [vmem:[%s2495_s16 + $0x70] ss:$8 sps:$4 sm:$0xff]  }
  0x8b   : > { %v2220_v16 = vld [vmem:[%s2495_s16 + $0xf0] ss:$8 sps:$4 sm:$0xff]  }
  0x8c   : > { %1886 = vmatpush3.bf16.msra.mxu0 %v2162_v40  ;;  %2075 = vmatpush3.bf16.msra.mxu1 %v2162_v40  ;;  %v525_v21 = vld [vmem:[#allocation2 + $0x38] sm:$0xff] }
  0x8d   : > { %1887 = vmatprep.subr.bf16.mxu0 %v2163_v41  ;;  %2068 = vmatprep.subr.bf16.mxu1 %v2163_v41  ;;  %v526_v31 = vld [vmem:[#allocation2 + $0x58] sm:$0xff]  ;;  %v527_v41 = vld [vmem:[#allocation2 + $0x40] sm:$0xff] }
  0x8e   : > { %v511_v39 = vld [vmem:[#allocation2 + $0xd8] sm:$0xff] }
  0x90   : > { %1888 = vmatpush3.bf16.msra.mxu0 %v2164_v42  ;;  %2076 = vmatpush3.bf16.msra.mxu1 %v2164_v42 }
  0x91   : > { %1889 = vmatprep.subr.bf16.mxu0 %v2165_v43  ;;  %2069 = vmatprep.subr.bf16.mxu1 %v2165_v43 }
  0x94   : > { %1890 = vmatpush3.bf16.msra.mxu0 %v2166_v44  ;;  %2077 = vmatpush3.bf16.msra.mxu1 %v2166_v44 }
  0x95   : > { %1891 = vmatprep.subr.bf16.mxu0 %v2167_v45  ;;  %2070 = vmatprep.subr.bf16.mxu1 %v2167_v45 }
  0x98   : > { %1892 = vmatpush3.bf16.msra.mxu0 %v2168_v46  ;;  %2078 = vmatpush3.bf16.msra.mxu1 %v2168_v46 }
  0x99   : > { %1893 = vmatprep.subr.bf16.mxu0 %v2169_v47  ;;  %2071 = vmatprep.subr.bf16.mxu1 %v2169_v47 }
  0x9c   : > { %1894 = vmatpush3.bf16.msra.mxu0 %v2170_v48  ;;  %2079 = vmatpush3.bf16.msra.mxu1 %v2170_v48 }
  0x9d   : > { %1895 = vmatprep.subr.bf16.mxu0 %v2171_v49  ;;  %2072 = vmatprep.subr.bf16.mxu1 %v2171_v49  ;;  %v512_v49 = vld [vmem:[#allocation2 + $0x18] sm:$0xff] }
  0xa0   : > { %1896 = vmatpush3.bf16.msra.mxu0 %v2172_v50  ;;  %2080 = vmatpush3.bf16.msra.mxu1 %v2172_v50 }
  0xa3   : > { %862 = vmatmul.mubr.bf16.vlgmr.msra.gmra.mxu0 %v2173_v51  ;;  %926 = vmatmul.mubr.bf16.vlgmr.msra.gmra.mxu1 %v2176_v52  ;;  %v528_v51 = vld [vmem:[#allocation2 + $0xc8] sm:$0xff] }
  0xa4   : > { %869 = vmatprep.mubr.bf16.mxu0 %v2179_v53  ;;  %933 = vmatprep.mubr.bf16.mxu1 %v2181_v54 }
  0xab   : > { %870 = vmatmul.mubr.bf16.gmra.mxu0 %v2183_v55  ;;  %934 = vmatmul.mubr.bf16.gmra.mxu1 %v2184_v56 }
  0xac   : > { %877 = vmatprep.mubr.bf16.mxu0 %v2185_v57  ;;  %941 = vmatprep.mubr.bf16.mxu1 %v2187_v58 }
  0xb3   : > { %878 = vmatmul.mubr.bf16.gmra.mxu0 %v2189_v59  ;;  %942 = vmatmul.mubr.bf16.gmra.mxu1 %v2190_v60  ;;  %v513_v59 = vld [vmem:[#allocation2 + $0x50] sm:$0xff] }
  0xb4   : > { %885 = vmatprep.mubr.bf16.mxu0 %v2191_v61  ;;  %949 = vmatprep.mubr.bf16.mxu1 %v2193_v62  ;;  %v529_v61 = vld [vmem:[#allocation2 + $0xe0] sm:$0xff] }
  0xbb   : > { %886 = vmatmul.mubr.bf16.gmra.mxu0 %v2195_v63  ;;  %950 = vmatmul.mubr.bf16.gmra.mxu1 %v2196_v0 }
  0xbc   : > { %893 = vmatprep.mubr.bf16.mxu0 %v2197_v1  ;;  %957 = vmatprep.mubr.bf16.mxu1 %v2199_v2 }
  0xc3   : > { %894 = vmatmul.mubr.bf16.gmra.mxu0 %v2201_v3  ;;  %958 = vmatmul.mubr.bf16.gmra.mxu1 %v2202_v4 }
  0xc4   : > { %901 = vmatprep.mubr.bf16.mxu0 %v2203_v5  ;;  %965 = vmatprep.mubr.bf16.mxu1 %v2205_v6  ;;  %v514_v5 = vld [vmem:[#allocation2 + $0x68] sm:$0xff] }
  0xcb   : > { %902 = vmatmul.mubr.bf16.gmra.mxu0 %v2207_v7  ;;  %966 = vmatmul.mubr.bf16.gmra.mxu1 %v2208_v8  ;;  %v530_v7 = vld [vmem:[#allocation2 + $0x90] sm:$0xff] }
  0xcc   : > { %909 = vmatprep.mubr.bf16.mxu0 %v2209_v9  ;;  %973 = vmatprep.mubr.bf16.mxu1 %v2211_v10 }
  0xd3   : > { %910 = vmatmul.mubr.bf16.gmra.mxu0 %v2213_v11  ;;  %974 = vmatmul.mubr.bf16.gmra.mxu1 %v2214_v12 }
  0xd4   : > { %917 = vmatprep.mubr.bf16.mxu0 %v2215_v13  ;;  %981 = vmatprep.mubr.bf16.mxu1 %v2217_v14 }
  0xdb   : > { %918 = vmatmul.mubr.bf16.gmra.mxu0 %v2219_v15  ;;  %982 = vmatmul.mubr.bf16.gmra.mxu1 %v2220_v16  ;;  %v515_v15 = vld [vmem:[#allocation2 + $0x30] sm:$0xff] }
 0x163   : > { %v1897_v17 = vpop.f32.mrf.mxu0  ;;  %v1945_v18 = vpop.f32.mrf.mxu1 }
 0x165   : > { %v1898_v20 = vpop.f32.mrf.mxu0  ;;  %v1946_v22 = vpop.f32.mrf.mxu1 }
 0x166   : > { %v1899_v23 = vadd.f32 %v1898_v20, %v1897_v17  ;;  %v1947_v24 = vadd.f32 %v1946_v22, %v1945_v18  ;;  %v531_v17 = vld [vmem:[#allocation2 + $0x70] sm:$0xff] }
 0x167   : > { %v1900_v25 = vpop.f32.mrf.mxu0  ;;  %v1948_v26 = vpop.f32.mrf.mxu1 }
 0x168   : > { %v990_v27 = vadd.f32 %v1899_v23, %v509_v19  ;;  %v1006_v28 = vadd.f32 %v1947_v24, %v525_v21 }
 0x169   : > { %v1901_v30 = vpop.f32.mrf.mxu0  ;;  %v1949_v32 = vpop.f32.mrf.mxu1 }
 0x16a   : > { %1022 = vst [vmem:[#allocation2 + $0xb0] sm:$0xff] %v990_v27  ;;  %1038 = vst [vmem:[#allocation2 + $0x38] sm:$0xff] %v1006_v28  ;;  %v1902_v33 = vadd.f32 %v1901_v30, %v1900_v25  ;;  %v1950_v34 = vadd.f32 %v1949_v32, %v1948_v26  ;;  %v516_v25 = vld [vmem:[#allocation2 + $0x48] sm:$0xff]  ;;  %v532_v27 = vld [vmem:[#allocation2 + $0xc0] sm:$0xff] }
 0x16b   : > { %v1903_v35 = vpop.f32.mrf.mxu0  ;;  %v1951_v36 = vpop.f32.mrf.mxu1 }
 0x16c   : > { %v991_v37 = vadd.f32 %v1902_v33, %v510_v29  ;;  %v1007_v38 = vadd.f32 %v1950_v34, %v526_v31 }
 0x16d   : > { %v1904_v40 = vpop.f32.mrf.mxu0  ;;  %v1952_v42 = vpop.f32.mrf.mxu1 }
 0x16e   : > { %1023 = vst [vmem:[#allocation2] sm:$0xff] %v991_v37  ;;  %1039 = vst [vmem:[#allocation2 + $0x58] sm:$0xff] %v1007_v38  ;;  %v1905_v43 = vadd.f32 %v1904_v40, %v1903_v35  ;;  %v1953_v44 = vadd.f32 %v1952_v42, %v1951_v36  ;;  %v517_v35 = vld [vmem:[#allocation2 + $0x80] sm:$0xff]  ;;  %v533_v37 = vld [vmem:[#allocation2 + $0xa8] sm:$0xff] }
 0x16f   : > { %v1906_v45 = vpop.f32.mrf.mxu0  ;;  %v1954_v46 = vpop.f32.mrf.mxu1 }
 0x170   : > { %v992_v47 = vadd.f32 %v1905_v43, %v511_v39  ;;  %v1008_v48 = vadd.f32 %v1953_v44, %v527_v41 }
 0x171   : > { %v1907_v50 = vpop.f32.mrf.mxu0  ;;  %v1955_v52 = vpop.f32.mrf.mxu1 }
 0x172   : > { %1024 = vst [vmem:[#allocation2 + $0xd8] sm:$0xff] %v992_v47  ;;  %1040 = vst [vmem:[#allocation2 + $0x40] sm:$0xff] %v1008_v48  ;;  %v1908_v53 = vadd.f32 %v1907_v50, %v1906_v45  ;;  %v1956_v54 = vadd.f32 %v1955_v52, %v1954_v46  ;;  %v518_v45 = vld [vmem:[#allocation2 + $0x88] sm:$0xff]  ;;  %v534_v47 = vld [vmem:[#allocation2 + $0xd0] sm:$0xff] }
 0x173   : > { %v1909_v55 = vpop.f32.mrf.mxu0  ;;  %v1957_v56 = vpop.f32.mrf.mxu1 }
 0x174   : > { %v993_v57 = vadd.f32 %v1908_v53, %v512_v49  ;;  %v1009_v58 = vadd.f32 %v1956_v54, %v528_v51 }
 0x175   : > { %v1910_v60 = vpop.f32.mrf.mxu0  ;;  %v1958_v62 = vpop.f32.mrf.mxu1 }
 0x176   : > { %1025 = vst [vmem:[#allocation2 + $0x18] sm:$0xff] %v993_v57  ;;  %1041 = vst [vmem:[#allocation2 + $0xc8] sm:$0xff] %v1009_v58  ;;  %v1911_v63 = vadd.f32 %v1910_v60, %v1909_v55  ;;  %v1959_v0 = vadd.f32 %v1958_v62, %v1957_v56  ;;  %v519_v55 = vld [vmem:[#allocation2 + $0xe8] sm:$0xff]  ;;  %v535_v57 = vld [vmem:[#allocation2 + $0x10] sm:$0xff] }
 0x177   : > { %v1912_v1 = vpop.f32.mrf.mxu0  ;;  %v1960_v2 = vpop.f32.mrf.mxu1 }
 0x178   : > { %v994_v3 = vadd.f32 %v1911_v63, %v513_v59  ;;  %v1010_v4 = vadd.f32 %v1959_v0, %v529_v61 }
 0x179   : > { %v1913_v6 = vpop.f32.mrf.mxu0  ;;  %v1961_v8 = vpop.f32.mrf.mxu1 }
 0x17a   : > { %1026 = vst [vmem:[#allocation2 + $0x50] sm:$0xff] %v994_v3  ;;  %1042 = vst [vmem:[#allocation2 + $0xe0] sm:$0xff] %v1010_v4  ;;  %v1914_v9 = vadd.f32 %v1913_v6, %v1912_v1  ;;  %v1962_v10 = vadd.f32 %v1961_v8, %v1960_v2  ;;  %v520_v1 = vld [vmem:[#allocation2 + $0xb8] sm:$0xff]  ;;  %v536_v3 = vld [vmem:[#allocation2 + $0x28] sm:$0xff] }
 0x17b   : > { %v1915_v11 = vpop.f32.mrf.mxu0  ;;  %v1963_v12 = vpop.f32.mrf.mxu1 }
 0x17c   : > { %v995_v13 = vadd.f32 %v1914_v9, %v514_v5  ;;  %v1011_v14 = vadd.f32 %v1962_v10, %v530_v7 }
 0x17d   : > { %v1916_v16 = vpop.f32.mrf.mxu0  ;;  %v1964_v18 = vpop.f32.mrf.mxu1 }
 0x17e   : > { %1027 = vst [vmem:[#allocation2 + $0x68] sm:$0xff] %v995_v13  ;;  %1043 = vst [vmem:[#allocation2 + $0x90] sm:$0xff] %v1011_v14  ;;  %v1917_v19 = vadd.f32 %v1916_v16, %v1915_v11  ;;  %v1965_v20 = vadd.f32 %v1964_v18, %v1963_v12  ;;  %v521_v11 = vld [vmem:[#allocation2 + $0x60] sm:$0xff] }
 0x17f   : > { %v1918_v21 = vpop.f32.mrf.mxu0  ;;  %v1966_v22 = vpop.f32.mrf.mxu1  ;;  %v537_v13 = vld [vmem:[#allocation2 + $0xa0] sm:$0xff] }
 0x180   : > { %v996_v23 = vadd.f32 %v1917_v19, %v515_v15  ;;  %v1012_v24 = vadd.f32 %v1965_v20, %v531_v17 }
 0x181   : > { %v1919_v26 = vpop.f32.mrf.mxu0  ;;  %v1967_v28 = vpop.f32.mrf.mxu1 }
 0x182   : > { %1028 = vst [vmem:[#allocation2 + $0x30] sm:$0xff] %v996_v23  ;;  %1044 = vst [vmem:[#allocation2 + $0x70] sm:$0xff] %v1012_v24  ;;  %v1920_v29 = vadd.f32 %v1919_v26, %v1918_v21  ;;  %v1968_v30 = vadd.f32 %v1967_v28, %v1966_v22  ;;  %v522_v21 = vld [vmem:[#allocation2 + $0xf0] sm:$0xff]  ;;  %v538_v23 = vld [vmem:[#allocation2 + $0xf8] sm:$0xff] }
 0x183   : > { %v1921_v31 = vpop.f32.mrf.mxu0  ;;  %v1969_v32 = vpop.f32.mrf.mxu1 }
 0x184   : > { %v997_v33 = vadd.f32 %v1920_v29, %v516_v25  ;;  %v1013_v34 = vadd.f32 %v1968_v30, %v532_v27 }
 0x185   : > { %v1922_v36 = vpop.f32.mrf.mxu0  ;;  %v1970_v38 = vpop.f32.mrf.mxu1 }
 0x186   : > { %1029 = vst [vmem:[#allocation2 + $0x48] sm:$0xff] %v997_v33  ;;  %1045 = vst [vmem:[#allocation2 + $0xc0] sm:$0xff] %v1013_v34  ;;  %v1923_v39 = vadd.f32 %v1922_v36, %v1921_v31  ;;  %v1971_v40 = vadd.f32 %v1970_v38, %v1969_v32  ;;  %v523_v31 = vld [vmem:[#allocation2 + $0x8] sm:$0xff]  ;;  %v539_v33 = vld [vmem:[#allocation2 + $0x20] sm:$0xff] }
 0x187   : > { %v1924_v41 = vpop.f32.mrf.mxu0  ;;  %v1972_v42 = vpop.f32.mrf.mxu1 }
 0x188   : > { %v998_v43 = vadd.f32 %v1923_v39, %v517_v35  ;;  %v1014_v44 = vadd.f32 %v1971_v40, %v533_v37 }
 0x189   : > { %v1925_v46 = vpop.f32.mrf.mxu0  ;;  %v1973_v48 = vpop.f32.mrf.mxu1 }
 0x18a   : > { %1030 = vst [vmem:[#allocation2 + $0x80] sm:$0xff] %v998_v43  ;;  %1046 = vst [vmem:[#allocation2 + $0xa8] sm:$0xff] %v1014_v44  ;;  %v1926_v49 = vadd.f32 %v1925_v46, %v1924_v41  ;;  %v1974_v50 = vadd.f32 %v1973_v48, %v1972_v42  ;;  %v524_v41 = vld [vmem:[#allocation2 + $0x78] sm:$0xff] }
 0x18b   : > { %v1927_v51 = vpop.f32.mrf.mxu0  ;;  %v1975_v52 = vpop.f32.mrf.mxu1  ;;  %v540_v43 = vld [vmem:[#allocation2 + $0x98] sm:$0xff] }
 0x18c   : > { %v999_v53 = vadd.f32 %v1926_v49, %v518_v45  ;;  %v1015_v54 = vadd.f32 %v1974_v50, %v534_v47 }
 0x18d   : > { %v1928_v56 = vpop.f32.mrf.mxu0  ;;  %v1976_v58 = vpop.f32.mrf.mxu1 }
 0x18e   : > { %1031 = vst [vmem:[#allocation2 + $0x88] sm:$0xff] %v999_v53  ;;  %1047 = vst [vmem:[#allocation2 + $0xd0] sm:$0xff] %v1015_v54  ;;  %v1929_v59 = vadd.f32 %v1928_v56, %v1927_v51  ;;  %v1977_v60 = vadd.f32 %v1976_v58, %v1975_v52 }
 0x18f   : > { %v1930_v61 = vpop.f32.mrf.mxu0  ;;  %v1978_v62 = vpop.f32.mrf.mxu1 }
 0x190   : > { %v1000_v63 = vadd.f32 %v1929_v59, %v519_v55  ;;  %v1016_v0 = vadd.f32 %v1977_v60, %v535_v57 }
 0x191   : > { %v1931_v2 = vpop.f32.mrf.mxu0  ;;  %v1979_v4 = vpop.f32.mrf.mxu1 }
 0x192   : > { %1032 = vst [vmem:[#allocation2 + $0xe8] sm:$0xff] %v1000_v63  ;;  %1048 = vst [vmem:[#allocation2 + $0x10] sm:$0xff] %v1016_v0  ;;  %v1932_v5 = vadd.f32 %v1931_v2, %v1930_v61  ;;  %v1980_v6 = vadd.f32 %v1979_v4, %v1978_v62 }
 0x193   : > { %v1933_v7 = vpop.f32.mrf.mxu0  ;;  %v1981_v8 = vpop.f32.mrf.mxu1 }
 0x194   : > { %v1001_v9 = vadd.f32 %v1932_v5, %v520_v1  ;;  %v1017_v10 = vadd.f32 %v1980_v6, %v536_v3 }
 0x195   : > { %v1934_v12 = vpop.f32.mrf.mxu0  ;;  %v1982_v14 = vpop.f32.mrf.mxu1 }
 0x196   : > { %1033 = vst [vmem:[#allocation2 + $0xb8] sm:$0xff] %v1001_v9  ;;  %1049 = vst [vmem:[#allocation2 + $0x28] sm:$0xff] %v1017_v10  ;;  %v1935_v15 = vadd.f32 %v1934_v12, %v1933_v7  ;;  %v1983_v16 = vadd.f32 %v1982_v14, %v1981_v8 }
 0x197   : > { %v1936_v17 = vpop.f32.mrf.mxu0  ;;  %v1984_v18 = vpop.f32.mrf.mxu1 }
 0x198   : > { %v1002_v19 = vadd.f32 %v1935_v15, %v521_v11  ;;  %v1018_v20 = vadd.f32 %v1983_v16, %v537_v13 }
 0x199   : > { %v1937_v22 = vpop.f32.mrf.mxu0  ;;  %v1985_v24 = vpop.f32.mrf.mxu1 }
 0x19a   : > { %1034 = vst [vmem:[#allocation2 + $0x60] sm:$0xff] %v1002_v19  ;;  %1050 = vst [vmem:[#allocation2 + $0xa0] sm:$0xff] %v1018_v20  ;;  %v1938_v25 = vadd.f32 %v1937_v22, %v1936_v17  ;;  %v1986_v26 = vadd.f32 %v1985_v24, %v1984_v18 }
 0x19b   : > { %v1939_v27 = vpop.f32.mrf.mxu0  ;;  %v1987_v28 = vpop.f32.mrf.mxu1 }
 0x19c   : > { %v1003_v29 = vadd.f32 %v1938_v25, %v522_v21  ;;  %v1019_v30 = vadd.f32 %v1986_v26, %v538_v23 }
 0x19d   : > { %v1940_v32 = vpop.f32.mrf.mxu0  ;;  %v1988_v34 = vpop.f32.mrf.mxu1 }
 0x19e   : > { %1035 = vst [vmem:[#allocation2 + $0xf0] sm:$0xff] %v1003_v29  ;;  %1051 = vst [vmem:[#allocation2 + $0xf8] sm:$0xff] %v1019_v30  ;;  %v1941_v35 = vadd.f32 %v1940_v32, %v1939_v27  ;;  %v1989_v36 = vadd.f32 %v1988_v34, %v1987_v28 }
 0x19f   : > { %v1942_v37 = vpop.f32.mrf.mxu0  ;;  %v1990_v38 = vpop.f32.mrf.mxu1 }
 0x1a0   : > { %v1004_v39 = vadd.f32 %v1941_v35, %v523_v31  ;;  %v1020_v40 = vadd.f32 %v1989_v36, %v539_v33 }
 0x1a1   : > { %v1943_v42 = vpop.f32.mrf.mxu0  ;;  %v1991_v44 = vpop.f32.mrf.mxu1 }
 0x1a2   : > { %1036 = vst [vmem:[#allocation2 + $0x8] sm:$0xff] %v1004_v39  ;;  %1052 = vst [vmem:[#allocation2 + $0x20] sm:$0xff] %v1020_v40  ;;  %v1944_v45 = vadd.f32 %v1943_v42, %v1942_v37  ;;  %v1992_v46 = vadd.f32 %v1991_v44, %v1990_v38 }
 0x1a4   : > { %v1005_v47 = vadd.f32 %v1944_v45, %v524_v41  ;;  %v1021_v48 = vadd.f32 %v1992_v46, %v540_v43 }
 0x1a6   : > { %1037 = vst [vmem:[#allocation2 + $0x78] sm:$0xff] %v1005_v47  ;;  %1053 = vst [vmem:[#allocation2 + $0x98] sm:$0xff] %v1021_v48 }
 0x1a7 PF: > { %p1710_p9 = scmp.ne.s32.totalorder %s2293_s7, 2 }
 0x1a9   : > { %1057 = sbr.rel (%p1710_p9) target bundleno = 689 (0x2b1), region = 86 }
 0x1ae   : > { %v2221_v49 = vld [vmem:[%s2659_s5 + $0x38] sm:$0xff]   ;;  %v2222_v50 = vld [vmem:[%s2659_s5 + $0x30] sm:$0xff]   ;;  %v2223_v51 = vld [vmem:[%s2659_s5 + $0x28] sm:$0xff]  }
 0x1af   : > { %2017 = vmatprep.subr.bf16.mxu0 %v2221_v49  ;;  %2081 = vmatprep.subr.bf16.mxu1 %v2221_v49  ;;  %v2224_v52 = vld [vmem:[%s2659_s5 + $0x20] sm:$0xff]   ;;  %v1058_v53 = vld [vmem:[#allocation2 + $0xb0] sm:$0xff]  ;;  %v1074_v58 = vld [vmem:[#allocation2 + $0x38] sm:$0xff] }
 0x1b0   : > { %2018 = vmatpush3.bf16.msra.mxu0 %v2221_v49  ;;  %2089 = vmatpush3.bf16.msra.mxu1 %v2221_v49  ;;  %v1059_v54 = vld [vmem:[#allocation2] sm:$0xff]  ;;  %v1075_v59 = vld [vmem:[#allocation2 + $0x58] sm:$0xff]  ;;  %v2226_v5 = vld [vmem:[%s2659_s5 + $0x10] sm:$0xff]  }
 0x1b1   : > { %2019 = vmatprep.subr.bf16.mxu0 %v2222_v50  ;;  %2082 = vmatprep.subr.bf16.mxu1 %v2222_v50  ;;  %v2572_v55 = vld [vmem:[%s2658_s4] ss:$0 sm:$0xff]  ;;  %v2225_v0 = vld [vmem:[%s2659_s5 + $0x18] sm:$0xff]   ;;  %v1077_v9 = vld [vmem:[#allocation2 + $0xc8] sm:$0xff] }
 0x1b2   : > { %v1097_v56 = vadd.f32 %v2572_v55, %v1058_v53  ;;  %v1098_v57 = vadd.f32 %v2572_v55, %v1059_v54  ;;  %v1113_v60 = vadd.f32 %v2572_v55, %v1074_v58  ;;  %v1114_v61 = vadd.f32 %v2572_v55, %v1075_v59  ;;  %v1060_v6 = vld [vmem:[#allocation2 + $0xd8] sm:$0xff]  ;;  %v1076_v8 = vld [vmem:[#allocation2 + $0x40] sm:$0xff]  ;;  %v1062_v10 = vld [vmem:[#allocation2 + $0x50] sm:$0xff] }
 0x1b3   : > { %v1061_v7 = vld [vmem:[#allocation2 + $0x18] sm:$0xff]  ;;  %v1063_v11 = vld [vmem:[#allocation2 + $0x68] sm:$0xff]  ;;  %v1099_v13 = vadd.f32 %v2572_v55, %v1060_v6  ;;  %v1078_v15 = vld [vmem:[#allocation2 + $0xe0] sm:$0xff]  ;;  %v1115_v17 = vadd.f32 %v2572_v55, %v1076_v8  ;;  %v1116_v18 = vadd.f32 %v2572_v55, %v1077_v9  ;;  %v1101_v19 = vadd.f32 %v2572_v55, %v1062_v10 }
 0x1b4   : > { %2020 = vmatpush3.bf16.msra.mxu0 %v2222_v50  ;;  %2090 = vmatpush3.bf16.msra.mxu1 %v2222_v50  ;;  %v1129_v62 = vmax.f32 %v1097_v56, 0.0  ;;  %v1130_v63 = vmax.f32 %v1098_v57, 0.0  ;;  %v1145_v1 = vmax.f32 %v1113_v60, 0.0  ;;  %v1146_v2 = vmax.f32 %v1114_v61, 0.0  ;;  %v2227_v12 = vld [vmem:[%s2659_s5 + $0x8] sm:$0xff]   ;;  %v1079_v16 = vld [vmem:[#allocation2 + $0x90] sm:$0xff] }
 0x1b5   : > { %2021 = vmatprep.subr.bf16.mxu0 %v2223_v51  ;;  %2083 = vmatprep.subr.bf16.mxu1 %v2223_v51  ;;  %v1100_v14 = vadd.f32 %v2572_v55, %v1061_v7  ;;  %v1102_v20 = vadd.f32 %v2572_v55, %v1063_v11  ;;  %v1117_v21 = vadd.f32 %v2572_v55, %v1078_v15  ;;  %v2228_v23 = vld [vmem:[%s2659_s5] sm:$0xff]   ;;  %v1131_v24 = vmax.f32 %v1099_v13, 0.0  ;;  %v1064_v30 = vld [vmem:[#allocation2 + $0x30] sm:$0xff]  ;;  %v1065_v31 = vld [vmem:[#allocation2 + $0x48] sm:$0xff] }
 0x1b6   : > { %v1161_v3 = vpack.c.bf16 %v1130_v63, %v1129_v62  ;;  %v1169_v4 = vpack.c.bf16 %v1146_v2, %v1145_v1  ;;  %v1118_v22 = vadd.f32 %v2572_v55, %v1079_v16  ;;  %v1147_v26 = vmax.f32 %v1115_v17, 0.0  ;;  %v1080_v32 = vld [vmem:[#allocation2 + $0x70] sm:$0xff]  ;;  %v1081_v35 = vld [vmem:[#allocation2 + $0xc0] sm:$0xff]  ;;  %v1067_v37 = vld [vmem:[#allocation2 + $0x88] sm:$0xff] }
 0x1b7   : > { %v1132_v25 = vmax.f32 %v1100_v14, 0.0  ;;  %v1148_v27 = vmax.f32 %v1116_v18, 0.0  ;;  %v1133_v28 = vmax.f32 %v1101_v19, 0.0  ;;  %v1134_v29 = vmax.f32 %v1102_v20, 0.0  ;;  %v1066_v36 = vld [vmem:[#allocation2 + $0x80] sm:$0xff]  ;;  %v1082_v39 = vld [vmem:[#allocation2 + $0xa8] sm:$0xff] }
 0x1b8   : > { %2022 = vmatpush3.bf16.msra.mxu0 %v2223_v51  ;;  %2091 = vmatpush3.bf16.msra.mxu1 %v2223_v51  ;;  %v1149_v33 = vmax.f32 %v1117_v21, 0.0  ;;  %v1150_v34 = vmax.f32 %v1118_v22, 0.0  ;;  %v1083_v40 = vld [vmem:[#allocation2 + $0xd0] sm:$0xff]  ;;  %v1103_v42 = vadd.f32 %v2572_v55, %v1064_v30  ;;  %v1104_v43 = vadd.f32 %v2572_v55, %v1065_v31  ;;  %v1068_v54 = vld [vmem:[#allocation2 + $0xe8] sm:$0xff]  ;;  %v1069_v56 = vld [vmem:[#allocation2 + $0xb8] sm:$0xff] }
 0x1b9   : > { %2023 = vmatprep.subr.bf16.mxu0 %v2224_v52  ;;  %2084 = vmatprep.subr.bf16.mxu1 %v2224_v52  ;;  %v1162_v38 = vpack.c.bf16 %v1132_v25, %v1131_v24  ;;  %v1170_v41 = vpack.c.bf16 %v1148_v27, %v1147_v26  ;;  %v1119_v44 = vadd.f32 %v2572_v55, %v1080_v32  ;;  %v1084_v61 = vld [vmem:[#allocation2 + $0x10] sm:$0xff]  ;;  %v1085_v62 = vld [vmem:[#allocation2 + $0x28] sm:$0xff]  ;;  %v1070_v1 = vld [vmem:[#allocation2 + $0x60] sm:$0xff] }
 0x1ba   : > { %2033 = vmatprep.mubr.bf16.mxu0 %v1161_v3  ;;  %2049 = vmatprep.mubr.bf16.mxu1 %v1169_v4  ;;  %v1163_v45 = vpack.c.bf16 %v1134_v29, %v1133_v28  ;;  %v1120_v46 = vadd.f32 %v2572_v55, %v1081_v35  ;;  %v1105_v47 = vadd.f32 %v2572_v55, %v1066_v36  ;;  %v1136_v53 = vmax.f32 %v1104_v43, 0.0  ;;  %v1071_v2 = vld [vmem:[#allocation2 + $0xf0] sm:$0xff]  ;;  %v1086_v3 = vld [vmem:[#allocation2 + $0xa0] sm:$0xff]  ;;  %v1087_v4 = vld [vmem:[#allocation2 + $0xf8] sm:$0xff] }
 0x1bb   : > { %v1106_v48 = vadd.f32 %v2572_v55, %v1067_v37  ;;  %v1171_v49 = vpack.c.bf16 %v1150_v34, %v1149_v33  ;;  %v1121_v50 = vadd.f32 %v2572_v55, %v1082_v39  ;;  %v1122_v51 = vadd.f32 %v2572_v55, %v1083_v40  ;;  %v1072_v21 = vld [vmem:[#allocation2 + $0x8] sm:$0xff]  ;;  %v1073_v22 = vld [vmem:[#allocation2 + $0x78] sm:$0xff]  ;;  %v1088_v27 = vld [vmem:[#allocation2 + $0x20] sm:$0xff] }
 0x1bc   : > { %2024 = vmatpush3.bf16.msra.mxu0 %v2224_v52  ;;  %2092 = vmatpush3.bf16.msra.mxu1 %v2224_v52  ;;  %v1135_v52 = vmax.f32 %v1103_v42, 0.0  ;;  %v1151_v57 = vmax.f32 %v1119_v44, 0.0  ;;  %v1152_v58 = vmax.f32 %v1120_v46, 0.0  ;;  %v1137_v59 = vmax.f32 %v1105_v47, 0.0  ;;  %v1089_v28 = vld [vmem:[#allocation2 + $0x98] sm:$0xff] }
 0x1bd   : > { %2025 = vmatprep.subr.bf16.mxu0 %v2225_v0  ;;  %2085 = vmatprep.subr.bf16.mxu1 %v2225_v0  ;;  %v1138_v60 = vmax.f32 %v1106_v48, 0.0  ;;  %v1153_v63 = vmax.f32 %v1121_v50, 0.0  ;;  %v1108_v6 = vadd.f32 %v2572_v55, %v1069_v56  ;;  %v1123_v7 = vadd.f32 %v2572_v55, %v1084_v61 }
 0x1be   : > { %v1124_v8 = vadd.f32 %v2572_v55, %v1085_v62  ;;  %v1164_v9 = vpack.c.bf16 %v1136_v53, %v1135_v52  ;;  %v1172_v10 = vpack.c.bf16 %v1152_v58, %v1151_v57  ;;  %v1110_v14 = vadd.f32 %v2572_v55, %v1071_v2 }
 0x1bf   : > { %v1165_v11 = vpack.c.bf16 %v1138_v60, %v1137_v59  ;;  %v1125_v15 = vadd.f32 %v2572_v55, %v1086_v3  ;;  %v1126_v16 = vadd.f32 %v2572_v55, %v1087_v4  ;;  %v1140_v18 = vmax.f32 %v1108_v6, 0.0 }
 0x1c0   : > { %2026 = vmatpush3.bf16.msra.mxu0 %v2225_v0  ;;  %2093 = vmatpush3.bf16.msra.mxu1 %v2225_v0  ;;  %v1154_v0 = vmax.f32 %v1122_v51, 0.0  ;;  %v1155_v19 = vmax.f32 %v1123_v7, 0.0  ;;  %v1156_v20 = vmax.f32 %v1124_v8, 0.0  ;;  %v1142_v24 = vmax.f32 %v1110_v14, 0.0 }
 0x1c1   : > { %2027 = vmatprep.subr.bf16.mxu0 %v2226_v5  ;;  %2086 = vmatprep.subr.bf16.mxu1 %v2226_v5  ;;  %v1157_v25 = vmax.f32 %v1125_v15, 0.0  ;;  %v1158_v26 = vmax.f32 %v1126_v16, 0.0  ;;  %v1111_v31 = vadd.f32 %v2572_v55, %v1072_v21  ;;  %v1112_v32 = vadd.f32 %v2572_v55, %v1073_v22 }
 0x1c2   : > { %v1173_v13 = vpack.c.bf16 %v1154_v0, %v1153_v63  ;;  %v1174_v30 = vpack.c.bf16 %v1156_v20, %v1155_v19  ;;  %v1127_v33 = vadd.f32 %v2572_v55, %v1088_v27  ;;  %v1128_v34 = vadd.f32 %v2572_v55, %v1089_v28 }
 0x1c3   : > { %v1175_v36 = vpack.c.bf16 %v1158_v26, %v1157_v25  ;;  %v1143_v37 = vmax.f32 %v1111_v31, 0.0 }
 0x1c4   : > { %2028 = vmatpush3.bf16.msra.mxu0 %v2226_v5  ;;  %2094 = vmatpush3.bf16.msra.mxu1 %v2226_v5  ;;  %v1107_v5 = vadd.f32 %v2572_v55, %v1068_v54  ;;  %v1159_v39 = vmax.f32 %v1127_v33, 0.0  ;;  %v1160_v40 = vmax.f32 %v1128_v34, 0.0 }
 0x1c5   : > { %2029 = vmatprep.subr.bf16.mxu0 %v2227_v12  ;;  %2087 = vmatprep.subr.bf16.mxu1 %v2227_v12 }
 0x1c6   : > { %v1139_v17 = vmax.f32 %v1107_v5, 0.0  ;;  %v1176_v42 = vpack.c.bf16 %v1160_v40, %v1159_v39 }
 0x1c8   : > { %2030 = vmatpush3.bf16.msra.mxu0 %v2227_v12  ;;  %2095 = vmatpush3.bf16.msra.mxu1 %v2227_v12  ;;  %v1109_v12 = vadd.f32 %v2572_v55, %v1070_v1  ;;  %v1166_v29 = vpack.c.bf16 %v1140_v18, %v1139_v17 }
 0x1c9   : > { %2031 = vmatprep.subr.bf16.mxu0 %v2228_v23  ;;  %2088 = vmatprep.subr.bf16.mxu1 %v2228_v23 }
 0x1cc   : > { %2032 = vmatpush3.bf16.msra.mxu0 %v2228_v23  ;;  %2096 = vmatpush3.bf16.msra.mxu1 %v2228_v23  ;;  %v1141_v23 = vmax.f32 %v1109_v12, 0.0 }
 0x1ce   : > { %v1167_v35 = vpack.c.bf16 %v1142_v24, %v1141_v23 }
 0x1cf   : > { %2034 = vmatmul.mubr.bf16.vlgmr.msra.gmra.mxu0 %v1162_v38  ;;  %2050 = vmatmul.mubr.bf16.vlgmr.msra.gmra.mxu1 %v1170_v41  ;;  %v1144_v38 = vmax.f32 %v1112_v32, 0.0 }
 0x1d0   : > { %2037 = vmatprep.mubr.bf16.mxu0 %v1163_v45  ;;  %2053 = vmatprep.mubr.bf16.mxu1 %v1171_v49 }
 0x1d1   : > { %v1168_v41 = vpack.c.bf16 %v1144_v38, %v1143_v37 }
 0x1d7   : > { %2038 = vmatmul.mubr.bf16.gmra.mxu0 %v1164_v9  ;;  %2054 = vmatmul.mubr.bf16.gmra.mxu1 %v1172_v10 }
 0x1d8   : > { %2041 = vmatprep.mubr.bf16.mxu0 %v1165_v11  ;;  %2057 = vmatprep.mubr.bf16.mxu1 %v1173_v13 }
 0x1df   : > { %2042 = vmatmul.mubr.bf16.gmra.mxu0 %v1166_v29  ;;  %2058 = vmatmul.mubr.bf16.gmra.mxu1 %v1174_v30 }
 0x1e0   : > { %2045 = vmatprep.mubr.bf16.mxu0 %v1167_v35  ;;  %2061 = vmatprep.mubr.bf16.mxu1 %v1175_v36 }
 0x1e7   : > { %2046 = vmatmul.mubr.bf16.gmra.mxu0 %v1168_v41  ;;  %2062 = vmatmul.mubr.bf16.gmra.mxu1 %v1176_v42 }
 0x28f   : > { %v2035_v43 = vpop.f32.mrf.mxu0  ;;  %v2051_v44 = vpop.f32.mrf.mxu1 }
 0x291   : > { %v1275_v55 = vpop.f32.mrf.mxu0  ;;  %v1339_v45 = vpop.f32.mrf.mxu1 }
 0x293   : > { %v2036_v46 = vpop.f32.mrf.mxu0  ;;  %v2052_v47 = vpop.f32.mrf.mxu1 }
 0x294   : > { %v1794_v48 = vpack.c.bf16 %v2036_v46, %v2035_v43  ;;  %v1834_v49 = vpack.c.bf16 %v2052_v47, %v2051_v44 }
 0x295   : > { %v1278_v50 = vpop.f32.mrf.mxu0  ;;  %v1342_v51 = vpop.f32.mrf.mxu1 }
 0x296   : > { %1866 = vst [vmem:[%s2493_s15 + $0x8] sm:$0xff] %v1794_v48   ;;  %1874 = vst [vmem:[%s2493_s15 + $0x48] sm:$0xff] %v1834_v49   ;;  %v1789_v52 = vpack.c.bf16 %v1278_v50, %v1275_v55  ;;  %v1829_v53 = vpack.c.bf16 %v1342_v51, %v1339_v45 }
 0x297   : > { %v2039_v54 = vpop.f32.mrf.mxu0  ;;  %v2055_v56 = vpop.f32.mrf.mxu1 }
 0x298   : > { %1790 = vst [vmem:[%s2493_s15] sm:$0xff] %v1789_v52   ;;  %1873 = vst [vmem:[%s2493_s15 + $0x40] sm:$0xff] %v1829_v53  }
 0x299   : > { %v1291_v57 = vpop.f32.mrf.mxu0  ;;  %v1355_v58 = vpop.f32.mrf.mxu1 }
 0x29b   : > { %v2040_v59 = vpop.f32.mrf.mxu0  ;;  %v2056_v60 = vpop.f32.mrf.mxu1 }
 0x29c   : > { %v1804_v61 = vpack.c.bf16 %v2040_v59, %v2039_v54  ;;  %v1844_v62 = vpack.c.bf16 %v2056_v60, %v2055_v56 }
 0x29d   : > { %v1294_v63 = vpop.f32.mrf.mxu0  ;;  %v1358_v0 = vpop.f32.mrf.mxu1 }
 0x29e   : > { %1868 = vst [vmem:[%s2493_s15 + $0x18] sm:$0xff] %v1804_v61   ;;  %1876 = vst [vmem:[%s2493_s15 + $0x58] sm:$0xff] %v1844_v62   ;;  %v1799_v1 = vpack.c.bf16 %v1294_v63, %v1291_v57  ;;  %v1839_v2 = vpack.c.bf16 %v1358_v0, %v1355_v58 }
 0x29f   : > { %v2043_v3 = vpop.f32.mrf.mxu0  ;;  %v2059_v4 = vpop.f32.mrf.mxu1 }
 0x2a0   : > { %1867 = vst [vmem:[%s2493_s15 + $0x10] sm:$0xff] %v1799_v1   ;;  %1875 = vst [vmem:[%s2493_s15 + $0x50] sm:$0xff] %v1839_v2  }
 0x2a1   : > { %v1307_v5 = vpop.f32.mrf.mxu0  ;;  %v1371_v6 = vpop.f32.mrf.mxu1 }
 0x2a3   : > { %v2044_v7 = vpop.f32.mrf.mxu0  ;;  %v2060_v8 = vpop.f32.mrf.mxu1 }
 0x2a4   : > { %v1814_v9 = vpack.c.bf16 %v2044_v7, %v2043_v3  ;;  %v1854_v10 = vpack.c.bf16 %v2060_v8, %v2059_v4 }
 0x2a5   : > { %v1310_v11 = vpop.f32.mrf.mxu0  ;;  %v1374_v12 = vpop.f32.mrf.mxu1 }
 0x2a6   : > { %1870 = vst [vmem:[%s2493_s15 + $0x28] sm:$0xff] %v1814_v9   ;;  %1878 = vst [vmem:[%s2493_s15 + $0x68] sm:$0xff] %v1854_v10   ;;  %v1809_v13 = vpack.c.bf16 %v1310_v11, %v1307_v5  ;;  %v1849_v14 = vpack.c.bf16 %v1374_v12, %v1371_v6 }
 0x2a7   : > { %v2047_v15 = vpop.f32.mrf.mxu0  ;;  %v2063_v16 = vpop.f32.mrf.mxu1 }
 0x2a8   : > { %1869 = vst [vmem:[%s2493_s15 + $0x20] sm:$0xff] %v1809_v13   ;;  %1877 = vst [vmem:[%s2493_s15 + $0x60] sm:$0xff] %v1849_v14  }
 0x2a9   : > { %v1323_v17 = vpop.f32.mrf.mxu0  ;;  %v1387_v18 = vpop.f32.mrf.mxu1 }
 0x2ab   : > { %v2048_v19 = vpop.f32.mrf.mxu0  ;;  %v2064_v20 = vpop.f32.mrf.mxu1 }
 0x2ac   : > { %v1824_v21 = vpack.c.bf16 %v2048_v19, %v2047_v15  ;;  %v1864_v22 = vpack.c.bf16 %v2064_v20, %v2063_v16 }
 0x2ad   : > { %v1326_v23 = vpop.f32.mrf.mxu0  ;;  %v1390_v24 = vpop.f32.mrf.mxu1 }
 0x2ae   : > { %1872 = vst [vmem:[%s2493_s15 + $0x38] sm:$0xff] %v1824_v21   ;;  %1880 = vst [vmem:[%s2493_s15 + $0x78] sm:$0xff] %v1864_v22   ;;  %v1819_v25 = vpack.c.bf16 %v1326_v23, %v1323_v17  ;;  %v1859_v26 = vpack.c.bf16 %v1390_v24, %v1387_v18 }
 0x2b0   : > { %1871 = vst [vmem:[%s2493_s15 + $0x30] sm:$0xff] %v1819_v25   ;;  %1879 = vst [vmem:[%s2493_s15 + $0x70] sm:$0xff] %v1859_v26  }
 0x2b1 PF: > { %s26_s11 = sadd.s32 1, %s2309_s11   ;;  %s2662_s1 = smov %s2289_s30 }
 0x2b2   : > { %p23_p10 = scmp.ge.s32.totalorder %s26_s11, 11   ;;  %s2663_s30 = smov %s2410_s0 }
 0x2b3   : > { %s2664_s7 = smov %s2301_s9  ;;  %s2665_s8 = smov %s2305_s10 }
 0x2b4   : > { %s2666_s9 = smov %s2669_s12  ;;  %s2667_s10 = smov %s2673_s13 }
 0x2b5   :  { %25 = sbr.rel (!%p23_p10) target bundleno = 29 (0x1d), region = 122 }

// kernel: _gcn2mlp2_jit.5
= control target key start
LH: loop header
LB: loop body
LE: loop exit
PB: predicated region body
PF: predicated region fallthrough
CT: control target
= control target key end

     0   :  { %v367_v0 = vmov 0.0   ;;  %vm368_vm0 = vmmov 0   ;;  %v250_v30 = vlaneseq  ;;  %s465_s1 = inlined_call_operand.vmem [shape: bf16[128,128], index: 1, kind: input, shape index: {}]   ;;  %s466_s3 = inlined_call_operand.vmem [shape: bf16[128,128], index: 3, kind: input, shape index: {}]   ;;  %s467_s0 = inlined_call_operand.vmem [shape: f32[3,8,128], index: 0, kind: input, shape index: {}]   ;;  %s468_s2 = inlined_call_operand.vmem [shape: f32[1,128], index: 2, kind: input, shape index: {}]   ;;  %s469_s4 = inlined_call_operand.vmem [shape: f32[1,128], index: 4, kind: input, shape index: {}]   ;;  %s470_s5 = inlined_call_operand.vmem [shape: f32[8,128], index: 5, kind: output, shape index: {}]  }
   0x1   :  { %305 = vmatprep.subr.bf16.mxu0 %v367_v0  ;;  %v347_v1 = vld [vmem:[%s465_s1 + $0x38] sm:$0xff]   ;;  %321 = vmatprep.mubr.msk.bf16.mxu0 %vm368_vm0, %v367_v0  ;;  %v348_v2 = vld [vmem:[%s465_s1 + $0x30] sm:$0xff]   ;;  %v349_v3 = vld [vmem:[%s465_s1 + $0x28] sm:$0xff]  }
   0x2   :  { %325 = vmatprep.subr.bf16.mxu1 %v367_v0  ;;  %341 = vmatprep.mubr.msk.bf16.mxu1 %vm368_vm0, %v367_v0  ;;  %v355_v4 = vld [vmem:[%s466_s3 + $0x38] sm:$0xff]   ;;  %v350_v5 = vld [vmem:[%s465_s1 + $0x20] sm:$0xff]   ;;  %v356_v6 = vld [vmem:[%s466_s3 + $0x30] sm:$0xff]   ;;  %v251_v31 = vand.u32 127, %v250_v30 }
   0x3   :  { %306 = vmatpush3.bf16.msra.mxu0 %v347_v1  ;;  %326 = vmatpush3.bf16.msra.mxu1 %v355_v4  ;;  %v351_v7 = vld [vmem:[%s465_s1 + $0x18] sm:$0xff]   ;;  %v357_v8 = vld [vmem:[%s466_s3 + $0x28] sm:$0xff]   ;;  %v352_v9 = vld [vmem:[%s465_s1 + $0x10] sm:$0xff]  }
   0x4   :  { %307 = vmatprep.subr.bf16.mxu0 %v367_v0  ;;  %327 = vmatprep.subr.bf16.mxu1 %v367_v0  ;;  %v21_v10 = vld [vmem:[%s467_s0] sm:$0xff]  ;;  %v22_v11 = vld [vmem:[%s467_s0 + $0x8] sm:$0xff]  ;;  %v23_v15 = vld [vmem:[%s467_s0 + $0x10] sm:$0xff]  ;;  %vm252_vm1 = vcmp.lt.s32.totalorder %v251_v31, 4 }
   0x5   :  { %v358_v12 = vld [vmem:[%s466_s3 + $0x20] sm:$0xff]   ;;  %v24_v13 = vadd.f32 %v22_v11, %v21_v10  ;;  %v353_v14 = vld [vmem:[%s465_s1 + $0x8] sm:$0xff]   ;;  %v359_v16 = vld [vmem:[%s466_s3 + $0x18] sm:$0xff]  }
   0x6   :  { %v354_v18 = vld [vmem:[%s465_s1] sm:$0xff]   ;;  %v360_v19 = vld [vmem:[%s466_s3 + $0x10] sm:$0xff]   ;;  %v361_v21 = vld [vmem:[%s466_s3 + $0x8] sm:$0xff]  }
   0x7   :  { %308 = vmatpush3.bf16.msra.mxu0 %v348_v2  ;;  %328 = vmatpush3.bf16.msra.mxu1 %v356_v6  ;;  %v25_v17 = vadd.f32 %v24_v13, %v23_v15  ;;  %v362_v22 = vld [vmem:[%s466_s3] sm:$0xff]  }
   0x8   :  { %309 = vmatprep.subr.bf16.mxu0 %v367_v0  ;;  %329 = vmatprep.subr.bf16.mxu1 %v367_v0  ;;  %v269_v23 = vld [vmem:[%s468_s2] ss:$0 sm:$0xff] }
   0x9   :  { %v26_v20 = vpack.c.bf16 %v25_v17, %v25_v17  ;;  %v278_v32 = vld [vmem:[%s469_s4] ss:$0 sm:$0xff] }
   0xb   :  { %310 = vmatpush3.bf16.msra.mxu0 %v349_v3  ;;  %330 = vmatpush3.bf16.msra.mxu1 %v357_v8 }
   0xc   :  { %311 = vmatprep.subr.bf16.mxu0 %v367_v0  ;;  %331 = vmatprep.subr.bf16.mxu1 %v367_v0 }
   0xf   :  { %312 = vmatpush3.bf16.msra.mxu0 %v350_v5  ;;  %332 = vmatpush3.bf16.msra.mxu1 %v358_v12 }
  0x10   :  { %313 = vmatprep.subr.bf16.mxu0 %v367_v0  ;;  %333 = vmatprep.subr.bf16.mxu1 %v367_v0 }
  0x13   :  { %314 = vmatpush3.bf16.msra.mxu0 %v351_v7  ;;  %334 = vmatpush3.bf16.msra.mxu1 %v359_v16 }
  0x14   :  { %315 = vmatprep.subr.bf16.mxu0 %v367_v0  ;;  %335 = vmatprep.subr.bf16.mxu1 %v367_v0 }
  0x17   :  { %316 = vmatpush3.bf16.msra.mxu0 %v352_v9  ;;  %336 = vmatpush3.bf16.msra.mxu1 %v360_v19 }
  0x18   :  { %317 = vmatprep.subr.bf16.mxu0 %v367_v0  ;;  %337 = vmatprep.subr.bf16.mxu1 %v367_v0 }
  0x1b   :  { %318 = vmatpush3.bf16.msra.mxu0 %v353_v14  ;;  %338 = vmatpush3.bf16.msra.mxu1 %v361_v21 }
  0x1c   :  { %319 = vmatprep.subr.bf16.mxu0 %v367_v0  ;;  %339 = vmatprep.subr.bf16.mxu1 %v367_v0 }
  0x1f   :  { %320 = vmatpush3.bf16.msra.mxu0 %v354_v18  ;;  %340 = vmatpush3.bf16.msra.mxu1 %v362_v22 }
  0x22   :  { %322 = vmatmul.mubr.bf16.vlgmr.msra.gmra.mxu0 %v26_v20 }
  0xe2   :  { %v132_v24 = vpop.f32.mrf.mxu0 }
  0xe3   :  { %v133_v25 = vadd.f32 %v269_v23, %v132_v24 }
  0xe4   :  { %v323_v26 = vpop.f32.mrf.mxu0 }
  0xe5   :  { %v138_v27 = vpack.c.bf16 %v133_v25, %v133_v25 }
  0xe6   :  { %v135_v28 = vpop.f32.mrf.mxu0 }
  0xe7   :  { %342 = vmatmul.mubr.bf16.vlgmr.msra.gmra.mxu1 %v138_v27 }
  0xe8   :  { %v324_v29 = vpop.f32.mrf.mxu0 }
 0x1a7   :  { %v244_v33 = vpop.f32.mrf.mxu1 }
 0x1a8   :  { %v245_v34 = vadd.f32 %v278_v32, %v244_v33 }
 0x1a9   :  { %v343_v35 = vpop.f32.mrf.mxu1 }
 0x1aa   :  { %v253_v36 = vsel %vm252_vm1, %v245_v34, -1e+30 }
 0x1ab   :  { %254 = vmax.xlane.f32.xlu0 %v253_v36  ;;  %v247_v37 = vpop.f32.mrf.mxu1 }
 0x1ad   :  { %v344_v38 = vpop.f32.mrf.mxu1 }
 0x234   :  { %v255_v39 = vpop.xlane.xlu0 %254 }
 0x235   :  { %v256_v40 = vsub.f32 %v253_v36, %v255_v39 }
 0x237   :  { %v257_v41 = vmul.f32 1.442695, %v256_v40 }
 0x239   :  { %363 = vpow2.f32 %v257_v41 }
 0x246   :  { %v364_v42 = vpop.eup %363 }
 0x247   :  { %259 = vadd.xlane.f32.xlu0 %v364_v42 }
 0x2d0   :  { %v260_v43 = vpop.xlane.xlu0 %259 }
 0x2d1   :  { %365 = vlog2.f32 %v260_v43 }
 0x2de   :  { %v366_v44 = vpop.eup %365 }
 0x2df   :  { %v262_v45 = vmul.f32 0.6931472, %v366_v44 }
 0x2e1   :  { %v263_v46 = vsub.f32 %v256_v40, %v262_v45 }
 0x2e3   :  { %264 = vst [vmem:[%s470_s5] sm:$0xff] %v263_v46 }

// kernel: _gcn2mlp2_jit.4
= control target key start
LH: loop header
LB: loop body
LE: loop exit
PB: predicated region body
PF: predicated region fallthrough
CT: control target
= control target key end

     0   :  { %s2079_s0 = inlined_call_operand.vmem [shape: s32[3,3], index: 0, kind: input, shape index: {}]   ;;  %s2080_s2 = inlined_call_operand.vmem [shape: bf16[768,768], index: 2, kind: input, shape index: {}]   ;;  %s2081_s3 = inlined_call_operand.vmem [shape: bf16[768,128], index: 3, kind: input, shape index: {}]   ;;  %s2082_s4 = inlined_call_operand.vmem [shape: f32[1,128], index: 4, kind: input, shape index: {}]   ;;  %s2083_s5 = inlined_call_operand.vmem [shape: bf16[8,768], index: 5, kind: input, shape index: {}]   ;;  %s2084_s6 = inlined_call_operand.vmem [shape: f32[3,8,128], index: 6, kind: output, shape index: {}]   ;;  %s2085_s1 = inlined_call_operand.vmem [shape: s32[3], index: 1, kind: input, shape index: {}]  }
   0x1   :  { %s11_s23 = sshll.u32 %s2079_s0, 4  ;;  %s15_s26 = sshll.u32 %s2085_s1, 4  ;;  %s12_s23 = int_to_ptr.vmem [resolvable:$true] %s11_s23  ;;  %s16_s26 = int_to_ptr.vmem [resolvable:$true] %s15_s26 }
   0x2   :  { %s1684_s27 = scalar_lea.vmem %s12_s23, 64  ;;  %p1689_p1 = scmp.lt.s32.totalorder %s12_s23, %s12_s23 }
   0x3   :  { %p1685_p0 = scmp.ne.s32.totalorder %s12_s23, %s1684_s27  ;;  %p1690_p2 = scmp.lt.s32.totalorder %s1684_s27, %s1684_s27 }
   0x5   :  { %p1691_p3 = por %p1690_p2, %p1689_p1 }
   0x7   :  { %p1692_p4 = pnand %p1691_p3, %p1685_p0 }
   0x9   :  { %1695 = shalt.err (!%p1692_p4)  }
   0xa   :  { %s1766_s28 = smov [#allocation4]   ;;  %s1696_s29 = scalar_lea.vmem %s16_s26, 16 }
   0xb   :  { %14 = dma.vmem_to_smem %s12_s23, 64, %s1766_s28, [#allocation3] }
   0xc   :  { %p1697_p5 = scmp.ne.s32.totalorder %s16_s26, %s1696_s29  ;;  %p1701_p6 = scmp.lt.s32.totalorder %s16_s26, %s16_s26 }
   0xd   :  { %p1702_p7 = scmp.lt.s32.totalorder %s1696_s29, %s1696_s29 }
   0xf   :  { %p1703_p8 = por %p1702_p7, %p1701_p6 }
  0x11   :  { %p1704_p9 = pnand %p1703_p8, %p1697_p5 }
  0x13   :  { %1707 = shalt.err (!%p1704_p9)  }
  0x14   :  { %s1767_s0 = smov [#allocation5]  }
  0x15   :  { %18 = dma.vmem_to_smem %s16_s26, 16, %s1767_s0, [#allocation3] }
  0x16   :  { %1736 = dma.done.wait [#allocation3], 80 }
  0x17   :  { %1737 = vsyncadd [#allocation3], 4294967216 }
  0x18   :  { %20 = sfence }
  0x19   :  { %s1810_s1 = smov 0   ;;  %s1812_s30 = smov 0  }
  0x1a   :  { %s1814_s7 = smov 0   ;;  %s1816_s8 = smov 0  }
  0x1b   :  { %s1818_s9 = smov 0   ;;  %s1820_s10 = smov 0  }
  0x1c   :  { %s1822_s11 = smov 0  }
  0x1d LB: > { %s35_s12 = sadd.s32 1, %s1756_s9  ;;  %s38_s13 = sadd.s32 1, %s1760_s10  ;;  %s1764_s11 = sphi %s1822_s11, %s26_s11   ;;  %s1760_s10 = sphi %s1820_s10, %s2091_s10   ;;  %s1756_s9 = sphi %s1818_s9, %s2090_s9   ;;  %s1752_s8 = sphi %s1816_s8, %s2089_s8   ;;  %s1748_s7 = sphi %s1814_s7, %s2088_s7   ;;  %s1744_s30 = sphi %s1812_s30, %s2087_s30   ;;  %s1740_s1 = sphi %s1810_s1, %s2086_s1  }
  0x1e   : > { %p36_p10 = scmp.ge.s32.totalorder %s35_s12, 3  ;;  %s42_s14 = sshra.s32 %s1756_s9, 7 }
  0x1f   : > { %s44_s15 = sadd.s32 %s1760_s10, %s42_s14  ;;  %s47_s16 = sand.u32 127, %s1756_s9 }
  0x20   : > { %s2093_s12 = smov (%p36_p10, %s35_s12), 0  ;;  %s2095_s13 = smov (!%p36_p10, %s38_s13), %s1760_s10 }
  0x21   : > { %s1334_s17 = sshll.u32 %s44_s15, 7  ;;  %p40_p11 = scmp.ge.s32.totalorder %s2095_s13, 3 }
  0x22   : > { %s48_s18 = sadd.s32 %s1334_s17, %s47_s16  ;;  %s50_s19 = sshra.s32 %s2093_s12, 7 }
  0x23   : > { %s2097_s13 = smov (%p40_p11, %s2095_s13), 0  ;;  %s55_s20 = sand.u32 127, %s2093_s12 }
  0x24   : > { %p70_p12 = scmp.ne.s32.totalorder %s1744_s30, %s1740_s1  ;;  %s49_s21 = sld [smem:[#allocation4 + %s48_s18]] }
  0x25   : > { %s52_s22 = sadd.s32 %s50_s19, %s2097_s13  ;;  %p71_p13 = scmp.eq.s32.totalorder %s1764_s11, 0 }
  0x26   : > { %s1335_s23 = sshll.u32 %s52_s22, 7  ;;  %s58_s26 = ssub.s32 %s1760_s10, %s2097_s13 }
  0x27   : > { %s56_s24 = sadd.s32 %s1335_s23, %s55_s20  ;;  %p72_p0 = por %p71_p13, %p70_p12 }
  0x28   : > { %s57_s25 = sld [smem:[#allocation4 + %s56_s24]]  ;;  %s63_s29 = sadd.s32 1, %s1744_s30 }
  0x29   : > { %p1337_p2 = scmp.ge.s32.totalorder %s1764_s11, 9 }
  0x2e   : > { %s59_s27 = ssub.s32 %s49_s21, %s57_s25  ;;  %196 = sbr.rel (%p1337_p2) target bundleno = 78 (0x4e), region = 24 }
  0x2f   : > { %s60_s28 = sor.u32 %s59_s27, %s58_s26 }
  0x30   : > { %p61_p1 = scmp.eq.s32.totalorder %s60_s28, 0 }
  0x32   : > { %s1865_s0 = scalar_select %p61_p1, %s1744_s30, %s63_s29  }
  0x33   : > { %199 = sbr.rel (!%p72_p0) target bundleno = 78 (0x4e), region = 28  ;;  %s211_s14 = sld [smem:[#allocation4 + %s48_s18]] (%p72_p0) }
  0x34   : > { %s201_s15 = sand.u32 (%p72_p0), 1, %s1744_s30   ;;  %s1558_s16 = smul.u32 (%p72_p0), 192, %s1760_s10 }
  0x35   : > { %s1338_s17 = sshll.u32 (%p72_p0), %s201_s15, 8 }
  0x36   : > { %s1878_s18 = scalar_lea.vmem (%p72_p0), [#allocation6], %s1338_s17 }
  0x39   : > { %s1341_s19 = sshll.u32 %s211_s14, 1 }
  0x3a   : > { %s215_s20 = sadd.s32 %s1558_s16, %s1341_s19 }
  0x3b   : > { %s1343_s22 = sshll.u32 %s215_s20, 2 }
  0x3c   : > { %s1873_s24 = scalar_lea.vmem %s2080_s2, %s1343_s22 }
  0x3d   : > { %v308_v0 = vld [vmem:[%s1873_s24] sm:$0xff]  ;;  %v310_v1 = vld [vmem:[%s1873_s24 + $0x18] sm:$0xff]  ;;  %v312_v2 = vld [vmem:[%s1873_s24 + $0x30] sm:$0xff] }
  0x3e   : > { %309 = vst [vmem:[%s1878_s18] sm:$0xff] %v308_v0  ;;  %311 = vst [vmem:[%s1878_s18 + $0x8] sm:$0xff] %v310_v1  ;;  %v314_v3 = vld [vmem:[%s1873_s24 + $0x48] sm:$0xff]  ;;  %v316_v4 = vld [vmem:[%s1873_s24 + $0x60] sm:$0xff] }
  0x3f   : > { %313 = vst [vmem:[%s1878_s18 + $0x10] sm:$0xff] %v312_v2  ;;  %v318_v5 = vld [vmem:[%s1873_s24 + $0x78] sm:$0xff]  ;;  %315 = vst [vmem:[%s1878_s18 + $0x18] sm:$0xff] %v314_v3  ;;  %v320_v6 = vld [vmem:[%s1873_s24 + $0x90] sm:$0xff] }
  0x40   : > { %317 = vst [vmem:[%s1878_s18 + $0x20] sm:$0xff] %v316_v4  ;;  %319 = vst [vmem:[%s1878_s18 + $0x28] sm:$0xff] %v318_v5  ;;  %v322_v7 = vld [vmem:[%s1873_s24 + $0xa8] sm:$0xff]  ;;  %v324_v8 = vld [vmem:[%s1873_s24 + $0xc0] sm:$0xff] }
  0x41   : > { %321 = vst [vmem:[%s1878_s18 + $0x30] sm:$0xff] %v320_v6  ;;  %323 = vst [vmem:[%s1878_s18 + $0x38] sm:$0xff] %v322_v7  ;;  %v326_v9 = vld [vmem:[%s1873_s24 + $0xd8] sm:$0xff]  ;;  %v328_v10 = vld [vmem:[%s1873_s24 + $0xf0] sm:$0xff] }
  0x42   : > { %325 = vst [vmem:[%s1878_s18 + $0x40] sm:$0xff] %v324_v8  ;;  %v330_v11 = vld [vmem:[%s1873_s24 + $0x108] sm:$0xff]  ;;  %327 = vst [vmem:[%s1878_s18 + $0x48] sm:$0xff] %v326_v9  ;;  %v332_v12 = vld [vmem:[%s1873_s24 + $0x120] sm:$0xff] }
  0x43   : > { %329 = vst [vmem:[%s1878_s18 + $0x50] sm:$0xff] %v328_v10  ;;  %331 = vst [vmem:[%s1878_s18 + $0x58] sm:$0xff] %v330_v11  ;;  %v334_v13 = vld [vmem:[%s1873_s24 + $0x138] sm:$0xff]  ;;  %v336_v14 = vld [vmem:[%s1873_s24 + $0x150] sm:$0xff] }
  0x44   : > { %333 = vst [vmem:[%s1878_s18 + $0x60] sm:$0xff] %v332_v12  ;;  %335 = vst [vmem:[%s1878_s18 + $0x68] sm:$0xff] %v334_v13  ;;  %v338_v15 = vld [vmem:[%s1873_s24 + $0x168] sm:$0xff]  ;;  %v340_v16 = vld [vmem:[%s1873_s24 + $0x180] sm:$0xff] }
  0x45   : > { %337 = vst [vmem:[%s1878_s18 + $0x70] sm:$0xff] %v336_v14  ;;  %v342_v17 = vld [vmem:[%s1873_s24 + $0x198] sm:$0xff]  ;;  %339 = vst [vmem:[%s1878_s18 + $0x78] sm:$0xff] %v338_v15  ;;  %v344_v18 = vld [vmem:[%s1873_s24 + $0x1b0] sm:$0xff] }
  0x46   : > { %341 = vst [vmem:[%s1878_s18 + $0x80] sm:$0xff] %v340_v16  ;;  %343 = vst [vmem:[%s1878_s18 + $0x88] sm:$0xff] %v342_v17  ;;  %v346_v19 = vld [vmem:[%s1873_s24 + $0x1c8] sm:$0xff]  ;;  %v348_v20 = vld [vmem:[%s1873_s24 + $0x1e0] sm:$0xff] }
  0x47   : > { %345 = vst [vmem:[%s1878_s18 + $0x90] sm:$0xff] %v344_v18  ;;  %347 = vst [vmem:[%s1878_s18 + $0x98] sm:$0xff] %v346_v19  ;;  %v350_v21 = vld [vmem:[%s1873_s24 + $0x1f8] sm:$0xff]  ;;  %v352_v22 = vld [vmem:[%s1873_s24 + $0x210] sm:$0xff] }
  0x48   : > { %349 = vst [vmem:[%s1878_s18 + $0xa0] sm:$0xff] %v348_v20  ;;  %v354_v23 = vld [vmem:[%s1873_s24 + $0x228] sm:$0xff]  ;;  %351 = vst [vmem:[%s1878_s18 + $0xa8] sm:$0xff] %v350_v21  ;;  %v356_v24 = vld [vmem:[%s1873_s24 + $0x240] sm:$0xff] }
  0x49   : > { %353 = vst [vmem:[%s1878_s18 + $0xb0] sm:$0xff] %v352_v22  ;;  %355 = vst [vmem:[%s1878_s18 + $0xb8] sm:$0xff] %v354_v23  ;;  %v358_v25 = vld [vmem:[%s1873_s24 + $0x258] sm:$0xff]  ;;  %v360_v26 = vld [vmem:[%s1873_s24 + $0x270] sm:$0xff] }
  0x4a   : > { %357 = vst [vmem:[%s1878_s18 + $0xc0] sm:$0xff] %v356_v24  ;;  %359 = vst [vmem:[%s1878_s18 + $0xc8] sm:$0xff] %v358_v25  ;;  %v362_v27 = vld [vmem:[%s1873_s24 + $0x288] sm:$0xff]  ;;  %v364_v28 = vld [vmem:[%s1873_s24 + $0x2a0] sm:$0xff] }
  0x4b   : > { %361 = vst [vmem:[%s1878_s18 + $0xd0] sm:$0xff] %v360_v26  ;;  %v366_v29 = vld [vmem:[%s1873_s24 + $0x2b8] sm:$0xff]  ;;  %363 = vst [vmem:[%s1878_s18 + $0xd8] sm:$0xff] %v362_v27  ;;  %v368_v30 = vld [vmem:[%s1873_s24 + $0x2d0] sm:$0xff] }
  0x4c   : > { %365 = vst [vmem:[%s1878_s18 + $0xe0] sm:$0xff] %v364_v28  ;;  %367 = vst [vmem:[%s1878_s18 + $0xe8] sm:$0xff] %v366_v29  ;;  %v370_v31 = vld [vmem:[%s1873_s24 + $0x2e8] sm:$0xff] }
  0x4d   : > { %369 = vst [vmem:[%s1878_s18 + $0xf0] sm:$0xff] %v368_v30  ;;  %371 = vst [vmem:[%s1878_s18 + $0xf8] sm:$0xff] %v370_v31 }
  0x4e PF: > { %p1344_p3 = scmp.ge.s32.totalorder %s1764_s11, 1  ;;  %p385_p4 = scmp.lt.s32.totalorder %s1764_s11, 10 }
  0x50   : > { %p386_p5 = pnand %p1344_p3, %p385_p4 }
  0x51   : > { %s392_s25 = sand.u32 (!%p386_p5), 1, %s1740_s1   ;;  %s1346_s26 = sshll.u32 (!%p386_p5), %s1752_s8, 1 }
  0x52   : > { %389 = sbr.rel (%p386_p5) target bundleno = 669 (0x29d), region = 70  ;;  %s1345_s27 = sshll.u32 (!%p386_p5), %s392_s25, 8 }
  0x53   : > { %p432_p6 = scmp.lt.s32.totalorder (!%p386_p5), %s1346_s26, 5  ;;  %p437_p7 = scmp.lt.s32.totalorder (!%p386_p5), %s1752_s8, 2 }
  0x54   : > { %s1957_s23 = scalar_lea.vmem (!%p386_p5), [#allocation6], %s1345_s27  ;;  %p1349_p8 = scmp.ne.s32.totalorder (!%p386_p5), %s1748_s7, 0 }
  0x57   : > { %s2099_s26 = smov (!%p432_p6, %s1346_s26), 5  ;;  %445 = sbr.rel (%p1349_p8) target bundleno = 109 (0x6d), region = 78 }
  0x58   : > { %s438_s28 = scalar_select %p437_p7, %s1752_s8, 2 }
  0x59   : > { %s1347_s29 = sshll.u32 %s2099_s26, 2 }
  0x5a   : > { %s1950_s16 = scalar_lea.vmem %s2083_s5, %s1347_s29  ;;  %s1348_s17 = sshll.u32 %s438_s28, 3 }
  0x5b   : > { %s1955_s22 = scalar_lea.vmem %s2084_s6, %s1348_s17 }
  0x5c   : > { %v1768_v32 = vmov 0.0  }
  0x5d   : > { %446 = vst [vmem:[#allocation2 + $0xb0] sm:$0xff] %v1768_v32  ;;  %447 = vst [vmem:[#allocation2] sm:$0xff] %v1768_v32 }
  0x5e   : > { %448 = vst [vmem:[#allocation2 + $0xd8] sm:$0xff] %v1768_v32  ;;  %449 = vst [vmem:[#allocation2 + $0x18] sm:$0xff] %v1768_v32 }
  0x5f   : > { %450 = vst [vmem:[#allocation2 + $0x50] sm:$0xff] %v1768_v32  ;;  %451 = vst [vmem:[#allocation2 + $0x68] sm:$0xff] %v1768_v32 }
  0x60   : > { %452 = vst [vmem:[#allocation2 + $0x30] sm:$0xff] %v1768_v32  ;;  %453 = vst [vmem:[#allocation2 + $0x48] sm:$0xff] %v1768_v32 }
  0x61   : > { %454 = vst [vmem:[#allocation2 + $0x80] sm:$0xff] %v1768_v32  ;;  %455 = vst [vmem:[#allocation2 + $0x88] sm:$0xff] %v1768_v32 }
  0x62   : > { %456 = vst [vmem:[#allocation2 + $0xe8] sm:$0xff] %v1768_v32  ;;  %457 = vst [vmem:[#allocation2 + $0xb8] sm:$0xff] %v1768_v32 }
  0x63   : > { %458 = vst [vmem:[#allocation2 + $0x60] sm:$0xff] %v1768_v32  ;;  %459 = vst [vmem:[#allocation2 + $0xf0] sm:$0xff] %v1768_v32 }
  0x64   : > { %460 = vst [vmem:[#allocation2 + $0x8] sm:$0xff] %v1768_v32  ;;  %461 = vst [vmem:[#allocation2 + $0x78] sm:$0xff] %v1768_v32 }
  0x65   : > { %462 = vst [vmem:[#allocation2 + $0x38] sm:$0xff] %v1768_v32  ;;  %463 = vst [vmem:[#allocation2 + $0x58] sm:$0xff] %v1768_v32 }
  0x66   : > { %464 = vst [vmem:[#allocation2 + $0x40] sm:$0xff] %v1768_v32  ;;  %465 = vst [vmem:[#allocation2 + $0xc8] sm:$0xff] %v1768_v32 }
  0x67   : > { %466 = vst [vmem:[#allocation2 + $0xe0] sm:$0xff] %v1768_v32  ;;  %467 = vst [vmem:[#allocation2 + $0x90] sm:$0xff] %v1768_v32 }
  0x68   : > { %468 = vst [vmem:[#allocation2 + $0x70] sm:$0xff] %v1768_v32  ;;  %469 = vst [vmem:[#allocation2 + $0xc0] sm:$0xff] %v1768_v32 }
  0x69   : > { %470 = vst [vmem:[#allocation2 + $0xa8] sm:$0xff] %v1768_v32  ;;  %471 = vst [vmem:[#allocation2 + $0xd0] sm:$0xff] %v1768_v32 }
  0x6a   : > { %472 = vst [vmem:[#allocation2 + $0x10] sm:$0xff] %v1768_v32  ;;  %473 = vst [vmem:[#allocation2 + $0x28] sm:$0xff] %v1768_v32 }
  0x6b   : > { %474 = vst [vmem:[#allocation2 + $0xa0] sm:$0xff] %v1768_v32  ;;  %475 = vst [vmem:[#allocation2 + $0xf8] sm:$0xff] %v1768_v32 }
  0x6c   : > { %476 = vst [vmem:[#allocation2 + $0x20] sm:$0xff] %v1768_v32  ;;  %477 = vst [vmem:[#allocation2 + $0x98] sm:$0xff] %v1768_v32 }
  0x6d PF: > { %s478_s1 = sld [smem:[#allocation5 + %s1752_s8]] }
  0x73   : > { %p1350_p9 = scmp.ge.s32.totalorder %s1748_s7, %s478_s1 }
  0x74   : > { %s483_s21 = sshra.s32 (!%p1350_p9), %s1748_s7, 7  ;;  %s488_s24 = sand.u32 (!%p1350_p9), 127, %s1748_s7 }
  0x75   : > { %482 = sbr.rel (%p1350_p9) target bundleno = 423 (0x1a7), region = 82  ;;  %s485_s18 = sadd.s32 (!%p1350_p9), %s1752_s8, %s483_s21 }
  0x76   : > { %s1351_s25 = sshll.u32 (!%p1350_p9), %s485_s18, 7 }
  0x77   : > { %s489_s26 = sadd.s32 (!%p1350_p9), %s1351_s25, %s488_s24 }
  0x78   : > { %s490_s27 = sld [smem:[#allocation4 + %s489_s26]] (!%p1350_p9) }
  0x7a   : > { %v1636_v33 = vld [vmem:[%s1957_s23 + $0x4] ss:$8 sps:$4 sm:$0xff]   ;;  %v1634_v51 = vld [vmem:[%s1957_s23] ss:$8 sps:$4 sm:$0xff]   ;;  %v1640_v53 = vld [vmem:[%s1957_s23 + $0x14] ss:$8 sps:$4 sm:$0xff]  }
  0x7b   : > { %v1639_v34 = vld [vmem:[%s1957_s23 + $0x84] ss:$8 sps:$4 sm:$0xff]   ;;  %880 = vmatprep.mubr.bf16.mxu0 %v1636_v33  ;;  %v1637_v52 = vld [vmem:[%s1957_s23 + $0x80] ss:$8 sps:$4 sm:$0xff]   ;;  %v1642_v54 = vld [vmem:[%s1957_s23 + $0x94] ss:$8 sps:$4 sm:$0xff]  }
  0x7c   : > { %944 = vmatprep.mubr.bf16.mxu1 %v1639_v34  ;;  %v1644_v55 = vld [vmem:[%s1957_s23 + $0x10] ss:$8 sps:$4 sm:$0xff]   ;;  %v1646_v57 = vld [vmem:[%s1957_s23 + $0x24] ss:$8 sps:$4 sm:$0xff]   ;;  %v1650_v59 = vld [vmem:[%s1957_s23 + $0x20] ss:$8 sps:$4 sm:$0xff]  }
  0x7d   : > { %v1645_v56 = vld [vmem:[%s1957_s23 + $0x90] ss:$8 sps:$4 sm:$0xff]   ;;  %v1648_v58 = vld [vmem:[%s1957_s23 + $0xa4] ss:$8 sps:$4 sm:$0xff]   ;;  %v1651_v60 = vld [vmem:[%s1957_s23 + $0xa0] ss:$8 sps:$4 sm:$0xff]  }
  0x7e   : > { %s1352_s28 = sshll.u32 %s490_s27, 8  ;;  %v1652_v61 = vld [vmem:[%s1957_s23 + $0x34] ss:$8 sps:$4 sm:$0xff]   ;;  %v1656_v63 = vld [vmem:[%s1957_s23 + $0x30] ss:$8 sps:$4 sm:$0xff]   ;;  %v529_v29 = vld [vmem:[#allocation2] sm:$0xff] }
  0x7f   : > { %s492_s29 = sshra.s32 %s1352_s28, 3  ;;  %v1654_v62 = vld [vmem:[%s1957_s23 + $0xb4] ss:$8 sps:$4 sm:$0xff]   ;;  %v1657_v0 = vld [vmem:[%s1957_s23 + $0xb0] ss:$8 sps:$4 sm:$0xff]  }
  0x80   : > { %s1353_s14 = sshll.u32 %s492_s29, 2  ;;  %v1658_v1 = vld [vmem:[%s1957_s23 + $0x44] ss:$8 sps:$4 sm:$0xff]   ;;  %v1662_v3 = vld [vmem:[%s1957_s23 + $0x40] ss:$8 sps:$4 sm:$0xff]   ;;  %v528_v19 = vld [vmem:[#allocation2 + $0xb0] sm:$0xff] }
  0x81   : > { %s1970_s19 = scalar_lea.vmem %s2081_s3, %s1353_s14  ;;  %v1660_v2 = vld [vmem:[%s1957_s23 + $0xc4] ss:$8 sps:$4 sm:$0xff]   ;;  %v1663_v4 = vld [vmem:[%s1957_s23 + $0xc0] ss:$8 sps:$4 sm:$0xff]   ;;  %v1664_v5 = vld [vmem:[%s1957_s23 + $0x54] ss:$8 sps:$4 sm:$0xff]  }
  0x82   : > { %v1618_v35 = vld [vmem:[%s1970_s19 + $0x78] sm:$0xff]   ;;  %v1620_v37 = vld [vmem:[%s1970_s19 + $0x70] sm:$0xff]   ;;  %v1622_v39 = vld [vmem:[%s1970_s19 + $0x68] sm:$0xff]  }
  0x83   : > { %v1619_v36 = vld [vmem:[%s1970_s19 + $0x38] sm:$0xff]   ;;  %1408 = vmatprep.subr.bf16.mxu0 %v1618_v35  ;;  %1542 = vmatprep.subr.bf16.mxu1 %v1618_v35  ;;  %v1621_v38 = vld [vmem:[%s1970_s19 + $0x30] sm:$0xff]   ;;  %v1623_v40 = vld [vmem:[%s1970_s19 + $0x28] sm:$0xff]  }
  0x84   : > { %1409 = vmatpush3.bf16.msra.mxu0 %v1619_v36  ;;  %1550 = vmatpush3.bf16.msra.mxu1 %v1619_v36  ;;  %v1624_v41 = vld [vmem:[%s1970_s19 + $0x60] sm:$0xff]   ;;  %v1626_v43 = vld [vmem:[%s1970_s19 + $0x58] sm:$0xff]   ;;  %v1628_v45 = vld [vmem:[%s1970_s19 + $0x50] sm:$0xff]  }
  0x85   : > { %1410 = vmatprep.subr.bf16.mxu0 %v1620_v37  ;;  %1543 = vmatprep.subr.bf16.mxu1 %v1620_v37  ;;  %v1625_v42 = vld [vmem:[%s1970_s19 + $0x20] sm:$0xff]   ;;  %v1627_v44 = vld [vmem:[%s1970_s19 + $0x18] sm:$0xff]   ;;  %v1629_v46 = vld [vmem:[%s1970_s19 + $0x10] sm:$0xff]  }
  0x86   : > { %v1630_v47 = vld [vmem:[%s1970_s19 + $0x48] sm:$0xff]   ;;  %v1632_v49 = vld [vmem:[%s1970_s19 + $0x40] sm:$0xff]   ;;  %v1666_v6 = vld [vmem:[%s1957_s23 + $0xd4] ss:$8 sps:$4 sm:$0xff]  }
  0x87   : > { %v1631_v48 = vld [vmem:[%s1970_s19 + $0x8] sm:$0xff]   ;;  %v1633_v50 = vld [vmem:[%s1970_s19] sm:$0xff]   ;;  %v1668_v7 = vld [vmem:[%s1957_s23 + $0x50] ss:$8 sps:$4 sm:$0xff]  }
  0x88   : > { %1411 = vmatpush3.bf16.msra.mxu0 %v1621_v38  ;;  %1551 = vmatpush3.bf16.msra.mxu1 %v1621_v38  ;;  %v1669_v8 = vld [vmem:[%s1957_s23 + $0xd0] ss:$8 sps:$4 sm:$0xff]   ;;  %v1670_v9 = vld [vmem:[%s1957_s23 + $0x64] ss:$8 sps:$4 sm:$0xff]   ;;  %v1674_v11 = vld [vmem:[%s1957_s23 + $0x60] ss:$8 sps:$4 sm:$0xff]  }
  0x89   : > { %1412 = vmatprep.subr.bf16.mxu0 %v1622_v39  ;;  %1544 = vmatprep.subr.bf16.mxu1 %v1622_v39  ;;  %v1672_v10 = vld [vmem:[%s1957_s23 + $0xe4] ss:$8 sps:$4 sm:$0xff]   ;;  %v1675_v12 = vld [vmem:[%s1957_s23 + $0xe0] ss:$8 sps:$4 sm:$0xff]   ;;  %v1676_v13 = vld [vmem:[%s1957_s23 + $0x74] ss:$8 sps:$4 sm:$0xff]  }
  0x8a   : > { %v1678_v14 = vld [vmem:[%s1957_s23 + $0xf4] ss:$8 sps:$4 sm:$0xff]   ;;  %v1680_v15 = vld [vmem:[%s1957_s23 + $0x70] ss:$8 sps:$4 sm:$0xff]  }
  0x8b   : > { %v1681_v16 = vld [vmem:[%s1957_s23 + $0xf0] ss:$8 sps:$4 sm:$0xff]  }
  0x8c   : > { %1413 = vmatpush3.bf16.msra.mxu0 %v1623_v40  ;;  %1552 = vmatpush3.bf16.msra.mxu1 %v1623_v40  ;;  %v544_v21 = vld [vmem:[#allocation2 + $0x38] sm:$0xff] }
  0x8d   : > { %1414 = vmatprep.subr.bf16.mxu0 %v1624_v41  ;;  %1545 = vmatprep.subr.bf16.mxu1 %v1624_v41  ;;  %v545_v31 = vld [vmem:[#allocation2 + $0x58] sm:$0xff]  ;;  %v546_v41 = vld [vmem:[#allocation2 + $0x40] sm:$0xff] }
  0x8e   : > { %v530_v39 = vld [vmem:[#allocation2 + $0xd8] sm:$0xff] }
  0x90   : > { %1415 = vmatpush3.bf16.msra.mxu0 %v1625_v42  ;;  %1553 = vmatpush3.bf16.msra.mxu1 %v1625_v42 }
  0x91   : > { %1416 = vmatprep.subr.bf16.mxu0 %v1626_v43  ;;  %1546 = vmatprep.subr.bf16.mxu1 %v1626_v43 }
  0x94   : > { %1417 = vmatpush3.bf16.msra.mxu0 %v1627_v44  ;;  %1554 = vmatpush3.bf16.msra.mxu1 %v1627_v44 }
  0x95   : > { %1418 = vmatprep.subr.bf16.mxu0 %v1628_v45  ;;  %1547 = vmatprep.subr.bf16.mxu1 %v1628_v45 }
  0x98   : > { %1419 = vmatpush3.bf16.msra.mxu0 %v1629_v46  ;;  %1555 = vmatpush3.bf16.msra.mxu1 %v1629_v46 }
  0x99   : > { %1420 = vmatprep.subr.bf16.mxu0 %v1630_v47  ;;  %1548 = vmatprep.subr.bf16.mxu1 %v1630_v47 }
  0x9c   : > { %1421 = vmatpush3.bf16.msra.mxu0 %v1631_v48  ;;  %1556 = vmatpush3.bf16.msra.mxu1 %v1631_v48 }
  0x9d   : > { %1422 = vmatprep.subr.bf16.mxu0 %v1632_v49  ;;  %1549 = vmatprep.subr.bf16.mxu1 %v1632_v49  ;;  %v531_v49 = vld [vmem:[#allocation2 + $0x18] sm:$0xff] }
  0xa0   : > { %1423 = vmatpush3.bf16.msra.mxu0 %v1633_v50  ;;  %1557 = vmatpush3.bf16.msra.mxu1 %v1633_v50 }
  0xa3   : > { %881 = vmatmul.mubr.bf16.vlgmr.msra.gmra.mxu0 %v1634_v51  ;;  %945 = vmatmul.mubr.bf16.vlgmr.msra.gmra.mxu1 %v1637_v52  ;;  %v547_v51 = vld [vmem:[#allocation2 + $0xc8] sm:$0xff] }
  0xa4   : > { %888 = vmatprep.mubr.bf16.mxu0 %v1640_v53  ;;  %952 = vmatprep.mubr.bf16.mxu1 %v1642_v54 }
  0xab   : > { %889 = vmatmul.mubr.bf16.gmra.mxu0 %v1644_v55  ;;  %953 = vmatmul.mubr.bf16.gmra.mxu1 %v1645_v56 }
  0xac   : > { %896 = vmatprep.mubr.bf16.mxu0 %v1646_v57  ;;  %960 = vmatprep.mubr.bf16.mxu1 %v1648_v58 }
  0xb3   : > { %897 = vmatmul.mubr.bf16.gmra.mxu0 %v1650_v59  ;;  %961 = vmatmul.mubr.bf16.gmra.mxu1 %v1651_v60  ;;  %v532_v59 = vld [vmem:[#allocation2 + $0x50] sm:$0xff] }
  0xb4   : > { %904 = vmatprep.mubr.bf16.mxu0 %v1652_v61  ;;  %968 = vmatprep.mubr.bf16.mxu1 %v1654_v62  ;;  %v548_v61 = vld [vmem:[#allocation2 + $0xe0] sm:$0xff] }
  0xbb   : > { %905 = vmatmul.mubr.bf16.gmra.mxu0 %v1656_v63  ;;  %969 = vmatmul.mubr.bf16.gmra.mxu1 %v1657_v0 }
  0xbc   : > { %912 = vmatprep.mubr.bf16.mxu0 %v1658_v1  ;;  %976 = vmatprep.mubr.bf16.mxu1 %v1660_v2 }
  0xc3   : > { %913 = vmatmul.mubr.bf16.gmra.mxu0 %v1662_v3  ;;  %977 = vmatmul.mubr.bf16.gmra.mxu1 %v1663_v4 }
  0xc4   : > { %920 = vmatprep.mubr.bf16.mxu0 %v1664_v5  ;;  %984 = vmatprep.mubr.bf16.mxu1 %v1666_v6  ;;  %v533_v5 = vld [vmem:[#allocation2 + $0x68] sm:$0xff] }
  0xcb   : > { %921 = vmatmul.mubr.bf16.gmra.mxu0 %v1668_v7  ;;  %985 = vmatmul.mubr.bf16.gmra.mxu1 %v1669_v8  ;;  %v549_v7 = vld [vmem:[#allocation2 + $0x90] sm:$0xff] }
  0xcc   : > { %928 = vmatprep.mubr.bf16.mxu0 %v1670_v9  ;;  %992 = vmatprep.mubr.bf16.mxu1 %v1672_v10 }
  0xd3   : > { %929 = vmatmul.mubr.bf16.gmra.mxu0 %v1674_v11  ;;  %993 = vmatmul.mubr.bf16.gmra.mxu1 %v1675_v12 }
  0xd4   : > { %936 = vmatprep.mubr.bf16.mxu0 %v1676_v13  ;;  %1000 = vmatprep.mubr.bf16.mxu1 %v1678_v14 }
  0xdb   : > { %937 = vmatmul.mubr.bf16.gmra.mxu0 %v1680_v15  ;;  %1001 = vmatmul.mubr.bf16.gmra.mxu1 %v1681_v16  ;;  %v534_v15 = vld [vmem:[#allocation2 + $0x30] sm:$0xff] }
 0x163   : > { %v1424_v17 = vpop.f32.mrf.mxu0  ;;  %v1472_v18 = vpop.f32.mrf.mxu1 }
 0x165   : > { %v1425_v20 = vpop.f32.mrf.mxu0  ;;  %v1473_v22 = vpop.f32.mrf.mxu1 }
 0x166   : > { %v1426_v23 = vadd.f32 %v1425_v20, %v1424_v17  ;;  %v1474_v24 = vadd.f32 %v1473_v22, %v1472_v18  ;;  %v550_v17 = vld [vmem:[#allocation2 + $0x70] sm:$0xff] }
 0x167   : > { %v1427_v25 = vpop.f32.mrf.mxu0  ;;  %v1475_v26 = vpop.f32.mrf.mxu1 }
 0x168   : > { %v1009_v27 = vadd.f32 %v1426_v23, %v528_v19  ;;  %v1025_v28 = vadd.f32 %v1474_v24, %v544_v21 }
 0x169   : > { %v1428_v30 = vpop.f32.mrf.mxu0  ;;  %v1476_v32 = vpop.f32.mrf.mxu1 }
 0x16a   : > { %1041 = vst [vmem:[#allocation2 + $0xb0] sm:$0xff] %v1009_v27  ;;  %1057 = vst [vmem:[#allocation2 + $0x38] sm:$0xff] %v1025_v28  ;;  %v1429_v33 = vadd.f32 %v1428_v30, %v1427_v25  ;;  %v1477_v34 = vadd.f32 %v1476_v32, %v1475_v26  ;;  %v535_v25 = vld [vmem:[#allocation2 + $0x48] sm:$0xff]  ;;  %v551_v27 = vld [vmem:[#allocation2 + $0xc0] sm:$0xff] }
 0x16b   : > { %v1430_v35 = vpop.f32.mrf.mxu0  ;;  %v1478_v36 = vpop.f32.mrf.mxu1 }
 0x16c   : > { %v1010_v37 = vadd.f32 %v1429_v33, %v529_v29  ;;  %v1026_v38 = vadd.f32 %v1477_v34, %v545_v31 }
 0x16d   : > { %v1431_v40 = vpop.f32.mrf.mxu0  ;;  %v1479_v42 = vpop.f32.mrf.mxu1 }
 0x16e   : > { %1042 = vst [vmem:[#allocation2] sm:$0xff] %v1010_v37  ;;  %1058 = vst [vmem:[#allocation2 + $0x58] sm:$0xff] %v1026_v38  ;;  %v1432_v43 = vadd.f32 %v1431_v40, %v1430_v35  ;;  %v1480_v44 = vadd.f32 %v1479_v42, %v1478_v36  ;;  %v536_v35 = vld [vmem:[#allocation2 + $0x80] sm:$0xff]  ;;  %v552_v37 = vld [vmem:[#allocation2 + $0xa8] sm:$0xff] }
 0x16f   : > { %v1433_v45 = vpop.f32.mrf.mxu0  ;;  %v1481_v46 = vpop.f32.mrf.mxu1 }
 0x170   : > { %v1011_v47 = vadd.f32 %v1432_v43, %v530_v39  ;;  %v1027_v48 = vadd.f32 %v1480_v44, %v546_v41 }
 0x171   : > { %v1434_v50 = vpop.f32.mrf.mxu0  ;;  %v1482_v52 = vpop.f32.mrf.mxu1 }
 0x172   : > { %1043 = vst [vmem:[#allocation2 + $0xd8] sm:$0xff] %v1011_v47  ;;  %1059 = vst [vmem:[#allocation2 + $0x40] sm:$0xff] %v1027_v48  ;;  %v1435_v53 = vadd.f32 %v1434_v50, %v1433_v45  ;;  %v1483_v54 = vadd.f32 %v1482_v52, %v1481_v46  ;;  %v537_v45 = vld [vmem:[#allocation2 + $0x88] sm:$0xff]  ;;  %v553_v47 = vld [vmem:[#allocation2 + $0xd0] sm:$0xff] }
 0x173   : > { %v1436_v55 = vpop.f32.mrf.mxu0  ;;  %v1484_v56 = vpop.f32.mrf.mxu1 }
 0x174   : > { %v1012_v57 = vadd.f32 %v1435_v53, %v531_v49  ;;  %v1028_v58 = vadd.f32 %v1483_v54, %v547_v51 }
 0x175   : > { %v1437_v60 = vpop.f32.mrf.mxu0  ;;  %v1485_v62 = vpop.f32.mrf.mxu1 }
 0x176   : > { %1044 = vst [vmem:[#allocation2 + $0x18] sm:$0xff] %v1012_v57  ;;  %1060 = vst [vmem:[#allocation2 + $0xc8] sm:$0xff] %v1028_v58  ;;  %v1438_v63 = vadd.f32 %v1437_v60, %v1436_v55  ;;  %v1486_v0 = vadd.f32 %v1485_v62, %v1484_v56  ;;  %v538_v55 = vld [vmem:[#allocation2 + $0xe8] sm:$0xff]  ;;  %v554_v57 = vld [vmem:[#allocation2 + $0x10] sm:$0xff] }
 0x177   : > { %v1439_v1 = vpop.f32.mrf.mxu0  ;;  %v1487_v2 = vpop.f32.mrf.mxu1 }
 0x178   : > { %v1013_v3 = vadd.f32 %v1438_v63, %v532_v59  ;;  %v1029_v4 = vadd.f32 %v1486_v0, %v548_v61 }
 0x179   : > { %v1440_v6 = vpop.f32.mrf.mxu0  ;;  %v1488_v8 = vpop.f32.mrf.mxu1 }
 0x17a   : > { %1045 = vst [vmem:[#allocation2 + $0x50] sm:$0xff] %v1013_v3  ;;  %1061 = vst [vmem:[#allocation2 + $0xe0] sm:$0xff] %v1029_v4  ;;  %v1441_v9 = vadd.f32 %v1440_v6, %v1439_v1  ;;  %v1489_v10 = vadd.f32 %v1488_v8, %v1487_v2  ;;  %v539_v1 = vld [vmem:[#allocation2 + $0xb8] sm:$0xff]  ;;  %v555_v3 = vld [vmem:[#allocation2 + $0x28] sm:$0xff] }
 0x17b   : > { %v1442_v11 = vpop.f32.mrf.mxu0  ;;  %v1490_v12 = vpop.f32.mrf.mxu1 }
 0x17c   : > { %v1014_v13 = vadd.f32 %v1441_v9, %v533_v5  ;;  %v1030_v14 = vadd.f32 %v1489_v10, %v549_v7 }
 0x17d   : > { %v1443_v16 = vpop.f32.mrf.mxu0  ;;  %v1491_v18 = vpop.f32.mrf.mxu1 }
 0x17e   : > { %1046 = vst [vmem:[#allocation2 + $0x68] sm:$0xff] %v1014_v13  ;;  %1062 = vst [vmem:[#allocation2 + $0x90] sm:$0xff] %v1030_v14  ;;  %v1444_v19 = vadd.f32 %v1443_v16, %v1442_v11  ;;  %v1492_v20 = vadd.f32 %v1491_v18, %v1490_v12  ;;  %v540_v11 = vld [vmem:[#allocation2 + $0x60] sm:$0xff] }
 0x17f   : > { %v1445_v21 = vpop.f32.mrf.mxu0  ;;  %v1493_v22 = vpop.f32.mrf.mxu1  ;;  %v556_v13 = vld [vmem:[#allocation2 + $0xa0] sm:$0xff] }
 0x180   : > { %v1015_v23 = vadd.f32 %v1444_v19, %v534_v15  ;;  %v1031_v24 = vadd.f32 %v1492_v20, %v550_v17 }
 0x181   : > { %v1446_v26 = vpop.f32.mrf.mxu0  ;;  %v1494_v28 = vpop.f32.mrf.mxu1 }
 0x182   : > { %1047 = vst [vmem:[#allocation2 + $0x30] sm:$0xff] %v1015_v23  ;;  %1063 = vst [vmem:[#allocation2 + $0x70] sm:$0xff] %v1031_v24  ;;  %v1447_v29 = vadd.f32 %v1446_v26, %v1445_v21  ;;  %v1495_v30 = vadd.f32 %v1494_v28, %v1493_v22  ;;  %v541_v21 = vld [vmem:[#allocation2 + $0xf0] sm:$0xff]  ;;  %v557_v23 = vld [vmem:[#allocation2 + $0xf8] sm:$0xff] }
 0x183   : > { %v1448_v31 = vpop.f32.mrf.mxu0  ;;  %v1496_v32 = vpop.f32.mrf.mxu1 }
 0x184   : > { %v1016_v33 = vadd.f32 %v1447_v29, %v535_v25  ;;  %v1032_v34 = vadd.f32 %v1495_v30, %v551_v27 }
 0x185   : > { %v1449_v36 = vpop.f32.mrf.mxu0  ;;  %v1497_v38 = vpop.f32.mrf.mxu1 }
 0x186   : > { %1048 = vst [vmem:[#allocation2 + $0x48] sm:$0xff] %v1016_v33  ;;  %1064 = vst [vmem:[#allocation2 + $0xc0] sm:$0xff] %v1032_v34  ;;  %v1450_v39 = vadd.f32 %v1449_v36, %v1448_v31  ;;  %v1498_v40 = vadd.f32 %v1497_v38, %v1496_v32  ;;  %v542_v31 = vld [vmem:[#allocation2 + $0x8] sm:$0xff]  ;;  %v558_v33 = vld [vmem:[#allocation2 + $0x20] sm:$0xff] }
 0x187   : > { %v1451_v41 = vpop.f32.mrf.mxu0  ;;  %v1499_v42 = vpop.f32.mrf.mxu1 }
 0x188   : > { %v1017_v43 = vadd.f32 %v1450_v39, %v536_v35  ;;  %v1033_v44 = vadd.f32 %v1498_v40, %v552_v37 }
 0x189   : > { %v1452_v46 = vpop.f32.mrf.mxu0  ;;  %v1500_v48 = vpop.f32.mrf.mxu1 }
 0x18a   : > { %1049 = vst [vmem:[#allocation2 + $0x80] sm:$0xff] %v1017_v43  ;;  %1065 = vst [vmem:[#allocation2 + $0xa8] sm:$0xff] %v1033_v44  ;;  %v1453_v49 = vadd.f32 %v1452_v46, %v1451_v41  ;;  %v1501_v50 = vadd.f32 %v1500_v48, %v1499_v42  ;;  %v543_v41 = vld [vmem:[#allocation2 + $0x78] sm:$0xff] }
 0x18b   : > { %v1454_v51 = vpop.f32.mrf.mxu0  ;;  %v1502_v52 = vpop.f32.mrf.mxu1  ;;  %v559_v43 = vld [vmem:[#allocation2 + $0x98] sm:$0xff] }
 0x18c   : > { %v1018_v53 = vadd.f32 %v1453_v49, %v537_v45  ;;  %v1034_v54 = vadd.f32 %v1501_v50, %v553_v47 }
 0x18d   : > { %v1455_v56 = vpop.f32.mrf.mxu0  ;;  %v1503_v58 = vpop.f32.mrf.mxu1 }
 0x18e   : > { %1050 = vst [vmem:[#allocation2 + $0x88] sm:$0xff] %v1018_v53  ;;  %1066 = vst [vmem:[#allocation2 + $0xd0] sm:$0xff] %v1034_v54  ;;  %v1456_v59 = vadd.f32 %v1455_v56, %v1454_v51  ;;  %v1504_v60 = vadd.f32 %v1503_v58, %v1502_v52 }
 0x18f   : > { %v1457_v61 = vpop.f32.mrf.mxu0  ;;  %v1505_v62 = vpop.f32.mrf.mxu1 }
 0x190   : > { %v1019_v63 = vadd.f32 %v1456_v59, %v538_v55  ;;  %v1035_v0 = vadd.f32 %v1504_v60, %v554_v57 }
 0x191   : > { %v1458_v2 = vpop.f32.mrf.mxu0  ;;  %v1506_v4 = vpop.f32.mrf.mxu1 }
 0x192   : > { %1051 = vst [vmem:[#allocation2 + $0xe8] sm:$0xff] %v1019_v63  ;;  %1067 = vst [vmem:[#allocation2 + $0x10] sm:$0xff] %v1035_v0  ;;  %v1459_v5 = vadd.f32 %v1458_v2, %v1457_v61  ;;  %v1507_v6 = vadd.f32 %v1506_v4, %v1505_v62 }
 0x193   : > { %v1460_v7 = vpop.f32.mrf.mxu0  ;;  %v1508_v8 = vpop.f32.mrf.mxu1 }
 0x194   : > { %v1020_v9 = vadd.f32 %v1459_v5, %v539_v1  ;;  %v1036_v10 = vadd.f32 %v1507_v6, %v555_v3 }
 0x195   : > { %v1461_v12 = vpop.f32.mrf.mxu0  ;;  %v1509_v14 = vpop.f32.mrf.mxu1 }
 0x196   : > { %1052 = vst [vmem:[#allocation2 + $0xb8] sm:$0xff] %v1020_v9  ;;  %1068 = vst [vmem:[#allocation2 + $0x28] sm:$0xff] %v1036_v10  ;;  %v1462_v15 = vadd.f32 %v1461_v12, %v1460_v7  ;;  %v1510_v16 = vadd.f32 %v1509_v14, %v1508_v8 }
 0x197   : > { %v1463_v17 = vpop.f32.mrf.mxu0  ;;  %v1511_v18 = vpop.f32.mrf.mxu1 }
 0x198   : > { %v1021_v19 = vadd.f32 %v1462_v15, %v540_v11  ;;  %v1037_v20 = vadd.f32 %v1510_v16, %v556_v13 }
 0x199   : > { %v1464_v22 = vpop.f32.mrf.mxu0  ;;  %v1512_v24 = vpop.f32.mrf.mxu1 }
 0x19a   : > { %1053 = vst [vmem:[#allocation2 + $0x60] sm:$0xff] %v1021_v19  ;;  %1069 = vst [vmem:[#allocation2 + $0xa0] sm:$0xff] %v1037_v20  ;;  %v1465_v25 = vadd.f32 %v1464_v22, %v1463_v17  ;;  %v1513_v26 = vadd.f32 %v1512_v24, %v1511_v18 }
 0x19b   : > { %v1466_v27 = vpop.f32.mrf.mxu0  ;;  %v1514_v28 = vpop.f32.mrf.mxu1 }
 0x19c   : > { %v1022_v29 = vadd.f32 %v1465_v25, %v541_v21  ;;  %v1038_v30 = vadd.f32 %v1513_v26, %v557_v23 }
 0x19d   : > { %v1467_v32 = vpop.f32.mrf.mxu0  ;;  %v1515_v34 = vpop.f32.mrf.mxu1 }
 0x19e   : > { %1054 = vst [vmem:[#allocation2 + $0xf0] sm:$0xff] %v1022_v29  ;;  %1070 = vst [vmem:[#allocation2 + $0xf8] sm:$0xff] %v1038_v30  ;;  %v1468_v35 = vadd.f32 %v1467_v32, %v1466_v27  ;;  %v1516_v36 = vadd.f32 %v1515_v34, %v1514_v28 }
 0x19f   : > { %v1469_v37 = vpop.f32.mrf.mxu0  ;;  %v1517_v38 = vpop.f32.mrf.mxu1 }
 0x1a0   : > { %v1023_v39 = vadd.f32 %v1468_v35, %v542_v31  ;;  %v1039_v40 = vadd.f32 %v1516_v36, %v558_v33 }
 0x1a1   : > { %v1470_v42 = vpop.f32.mrf.mxu0  ;;  %v1518_v44 = vpop.f32.mrf.mxu1 }
 0x1a2   : > { %1055 = vst [vmem:[#allocation2 + $0x8] sm:$0xff] %v1023_v39  ;;  %1071 = vst [vmem:[#allocation2 + $0x20] sm:$0xff] %v1039_v40  ;;  %v1471_v45 = vadd.f32 %v1470_v42, %v1469_v37  ;;  %v1519_v46 = vadd.f32 %v1518_v44, %v1517_v38 }
 0x1a4   : > { %v1024_v47 = vadd.f32 %v1471_v45, %v543_v41  ;;  %v1040_v48 = vadd.f32 %v1519_v46, %v559_v43 }
 0x1a6   : > { %1056 = vst [vmem:[#allocation2 + $0x78] sm:$0xff] %v1024_v47  ;;  %1072 = vst [vmem:[#allocation2 + $0x98] sm:$0xff] %v1040_v48 }
 0x1a7 PF: > { %p1402_p10 = scmp.ne.s32.totalorder %s1748_s7, 2 }
 0x1a9   : > { %1076 = sbr.rel (%p1402_p10) target bundleno = 669 (0x29d), region = 86 }
 0x1ae   : > { %v1107_v49 = vld [vmem:[#allocation2 + $0x20] sm:$0xff]  ;;  %v1108_v50 = vld [vmem:[#allocation2 + $0x98] sm:$0xff]  ;;  %v1091_v54 = vld [vmem:[#allocation2 + $0x8] sm:$0xff] }
 0x1af   : > { %v2022_v51 = vld [vmem:[%s2082_s4] ss:$0 sm:$0xff]  ;;  %v1092_v55 = vld [vmem:[#allocation2 + $0x78] sm:$0xff]  ;;  %v1090_v62 = vld [vmem:[#allocation2 + $0xf0] sm:$0xff] }
 0x1b0   : > { %v1146_v52 = vadd.f32 %v2022_v51, %v1107_v49  ;;  %v1147_v53 = vadd.f32 %v2022_v51, %v1108_v50  ;;  %v1105_v56 = vld [vmem:[#allocation2 + $0xa0] sm:$0xff]  ;;  %v1130_v57 = vadd.f32 %v2022_v51, %v1091_v54  ;;  %v1131_v58 = vadd.f32 %v2022_v51, %v1092_v55  ;;  %v1106_v59 = vld [vmem:[#allocation2 + $0xf8] sm:$0xff]  ;;  %v1103_v3 = vld [vmem:[#allocation2 + $0x10] sm:$0xff] }
 0x1b1   : > { %v1144_v60 = vadd.f32 %v2022_v51, %v1105_v56  ;;  %v1089_v61 = vld [vmem:[#allocation2 + $0x60] sm:$0xff]  ;;  %v1145_v1 = vadd.f32 %v2022_v51, %v1106_v59  ;;  %v1104_v4 = vld [vmem:[#allocation2 + $0x28] sm:$0xff]  ;;  %v1129_v9 = vadd.f32 %v2022_v51, %v1090_v62  ;;  %v1088_v10 = vld [vmem:[#allocation2 + $0xb8] sm:$0xff]  ;;  %v1142_v15 = vadd.f32 %v2022_v51, %v1103_v3 }
 0x1b2   : > { %v1178_v63 = vmax.f32 %v1146_v52, 0.0  ;;  %v1179_v0 = vmax.f32 %v1147_v53, 0.0  ;;  %v1128_v2 = vadd.f32 %v2022_v51, %v1089_v61  ;;  %v1087_v5 = vld [vmem:[#allocation2 + $0xe8] sm:$0xff]  ;;  %v1162_v6 = vmax.f32 %v1130_v57, 0.0  ;;  %v1102_v16 = vld [vmem:[#allocation2 + $0xd0] sm:$0xff]  ;;  %v1085_v21 = vld [vmem:[#allocation2 + $0x80] sm:$0xff] }
 0x1b3   : > { %v1163_v7 = vmax.f32 %v1131_v58, 0.0  ;;  %v1176_v8 = vmax.f32 %v1144_v60, 0.0  ;;  %v1101_v11 = vld [vmem:[#allocation2 + $0xa8] sm:$0xff]  ;;  %v1177_v13 = vmax.f32 %v1145_v1, 0.0  ;;  %v1161_v18 = vmax.f32 %v1129_v9, 0.0  ;;  %v1099_v27 = vld [vmem:[#allocation2 + $0x70] sm:$0xff] }
 0x1b4   : > { %v1196_v12 = vpack.c.bf16 %v1179_v0, %v1178_v63  ;;  %v1160_v14 = vmax.f32 %v1128_v2, 0.0  ;;  %v1143_v19 = vadd.f32 %v2022_v51, %v1104_v4  ;;  %v1126_v20 = vadd.f32 %v2022_v51, %v1087_v5  ;;  %v1086_v22 = vld [vmem:[#allocation2 + $0x88] sm:$0xff]  ;;  %v1100_v28 = vld [vmem:[#allocation2 + $0xc0] sm:$0xff]  ;;  %v1083_v33 = vld [vmem:[#allocation2 + $0x30] sm:$0xff] }
 0x1b5   : > { %v1188_v17 = vpack.c.bf16 %v1163_v7, %v1162_v6  ;;  %v1195_v23 = vpack.c.bf16 %v1177_v13, %v1176_v8  ;;  %v1174_v24 = vmax.f32 %v1142_v15, 0.0  ;;  %v1127_v25 = vadd.f32 %v2022_v51, %v1088_v10  ;;  %v1084_v38 = vld [vmem:[#allocation2 + $0x48] sm:$0xff]  ;;  %v1097_v43 = vld [vmem:[#allocation2 + $0xe0] sm:$0xff]  ;;  %v1098_v44 = vld [vmem:[#allocation2 + $0x90] sm:$0xff] }
 0x1b6   : > { %1520 = vmatprep.subr.bf16.mxu0 %v1196_v12  ;;  %v1140_v26 = vadd.f32 %v2022_v51, %v1101_v11  ;;  %v1187_v29 = vpack.c.bf16 %v1161_v18, %v1160_v14  ;;  %v1175_v30 = vmax.f32 %v1143_v19, 0.0  ;;  %v1158_v31 = vmax.f32 %v1126_v20, 0.0  ;;  %v1081_v52 = vld [vmem:[#allocation2 + $0x50] sm:$0xff]  ;;  %v1082_v53 = vld [vmem:[#allocation2 + $0x68] sm:$0xff]  ;;  %v1095_v58 = vld [vmem:[#allocation2 + $0x40] sm:$0xff] }
 0x1b7   : > { %1521 = vmatpush3.bf16.msra.mxu0 %v1188_v17  ;;  %v1141_v32 = vadd.f32 %v2022_v51, %v1102_v16  ;;  %v1159_v34 = vmax.f32 %v1127_v25, 0.0  ;;  %v1124_v36 = vadd.f32 %v2022_v51, %v1085_v21  ;;  %v1125_v37 = vadd.f32 %v2022_v51, %v1086_v22  ;;  %v1096_v59 = vld [vmem:[#allocation2 + $0xc8] sm:$0xff]  ;;  %v1079_v6 = vld [vmem:[#allocation2 + $0xd8] sm:$0xff]  ;;  %v1180_v8 = vld [vmem:[%s1950_s16] sm:$0xff] }
 0x1b8   : > { %1522 = vmatprep.subr.bf16.mxu0 %v1195_v23  ;;  %v1172_v35 = vmax.f32 %v1140_v26, 0.0  ;;  %v1194_v39 = vpack.c.bf16 %v1175_v30, %v1174_v24  ;;  %v1138_v41 = vadd.f32 %v2022_v51, %v1099_v27  ;;  %v1139_v42 = vadd.f32 %v2022_v51, %v1100_v28  ;;  %v1080_v7 = vld [vmem:[#allocation2 + $0x18] sm:$0xff]  ;;  %v1077_v22 = vld [vmem:[#allocation2 + $0xb0] sm:$0xff]  ;;  %v1078_v23 = vld [vmem:[#allocation2] sm:$0xff] }
 0x1b9   : > { %v1173_v40 = vmax.f32 %v1141_v32, 0.0  ;;  %v1186_v45 = vpack.c.bf16 %v1159_v34, %v1158_v31  ;;  %v1122_v46 = vadd.f32 %v2022_v51, %v1083_v33  ;;  %v1156_v48 = vmax.f32 %v1124_v36, 0.0  ;;  %v1093_v9 = vld [vmem:[#allocation2 + $0x38] sm:$0xff] }
 0x1ba   : > { %v1157_v49 = vmax.f32 %v1125_v37, 0.0  ;;  %v1123_v50 = vadd.f32 %v2022_v51, %v1084_v38  ;;  %v1170_v54 = vmax.f32 %v1138_v41, 0.0  ;;  %v1171_v55 = vmax.f32 %v1139_v42, 0.0  ;;  %v1094_v10 = vld [vmem:[#allocation2 + $0x58] sm:$0xff] }
 0x1bb   : > { %1523 = vmatpush3.bf16.msra.mxu0 %v1187_v29  ;;  %v1193_v47 = vpack.c.bf16 %v1173_v40, %v1172_v35  ;;  %v1136_v56 = vadd.f32 %v2022_v51, %v1097_v43  ;;  %v1137_v57 = vadd.f32 %v2022_v51, %v1098_v44  ;;  %v1154_v60 = vmax.f32 %v1122_v46, 0.0 }
 0x1bc   : > { %1524 = vmatprep.subr.bf16.mxu0 %v1194_v39  ;;  %v1155_v61 = vmax.f32 %v1123_v50, 0.0  ;;  %v1120_v62 = vadd.f32 %v2022_v51, %v1081_v52  ;;  %v1121_v63 = vadd.f32 %v2022_v51, %v1082_v53  ;;  %v1185_v0 = vpack.c.bf16 %v1157_v49, %v1156_v48 }
 0x1bd   : > { %v1168_v1 = vmax.f32 %v1136_v56, 0.0  ;;  %v1169_v2 = vmax.f32 %v1137_v57, 0.0  ;;  %v1192_v3 = vpack.c.bf16 %v1171_v55, %v1170_v54  ;;  %v1134_v4 = vadd.f32 %v2022_v51, %v1095_v58 }
 0x1be   : > { %v1135_v5 = vadd.f32 %v2022_v51, %v1096_v59  ;;  %v1184_v11 = vpack.c.bf16 %v1155_v61, %v1154_v60  ;;  %v1152_v12 = vmax.f32 %v1120_v62, 0.0  ;;  %v1153_v13 = vmax.f32 %v1121_v63, 0.0 }
 0x1bf   : > { %1525 = vmatpush3.bf16.msra.mxu0 %v1186_v45  ;;  %v1191_v14 = vpack.c.bf16 %v1169_v2, %v1168_v1  ;;  %v1118_v15 = vadd.f32 %v2022_v51, %v1079_v6  ;;  %v1119_v16 = vadd.f32 %v2022_v51, %v1080_v7  ;;  %v1405_v17 = vcombine.high %v1180_v8, %v1180_v8 }
 0x1c0   : > { %1526 = vmatprep.subr.bf16.mxu0 %v1193_v47  ;;  %v1166_v18 = vmax.f32 %v1134_v4, 0.0  ;;  %v1167_v19 = vmax.f32 %v1135_v5, 0.0  ;;  %v1132_v20 = vadd.f32 %v2022_v51, %v1093_v9  ;;  %v1133_v21 = vadd.f32 %v2022_v51, %v1094_v10 }
 0x1c1   : > { %1236 = vmatprep.mubr.bf16.mxu0 %v1405_v17  ;;  %v1183_v24 = vpack.c.bf16 %v1153_v13, %v1152_v12  ;;  %v1150_v25 = vmax.f32 %v1118_v15, 0.0  ;;  %v1151_v26 = vmax.f32 %v1119_v16, 0.0  ;;  %v1116_v27 = vadd.f32 %v2022_v51, %v1077_v22 }
 0x1c2   : > { %v1117_v28 = vadd.f32 %v2022_v51, %v1078_v23  ;;  %v1190_v29 = vpack.c.bf16 %v1167_v19, %v1166_v18  ;;  %v1164_v30 = vmax.f32 %v1132_v20, 0.0  ;;  %v1165_v31 = vmax.f32 %v1133_v21, 0.0 }
 0x1c3   : > { %1527 = vmatpush3.bf16.msra.mxu0 %v1185_v0  ;;  %v1182_v32 = vpack.c.bf16 %v1151_v26, %v1150_v25  ;;  %v1148_v33 = vmax.f32 %v1116_v27, 0.0  ;;  %v1404_v37 = vcombine.low %v1180_v8, %v1180_v8 }
 0x1c4   : > { %1528 = vmatprep.subr.bf16.mxu0 %v1192_v3  ;;  %v1149_v34 = vmax.f32 %v1117_v28, 0.0  ;;  %v1189_v35 = vpack.c.bf16 %v1165_v31, %v1164_v30 }
 0x1c6   : > { %v1181_v36 = vpack.c.bf16 %v1149_v34, %v1148_v33 }
 0x1c7   : > { %1529 = vmatpush3.bf16.msra.mxu0 %v1184_v11 }
 0x1c8   : > { %1530 = vmatprep.subr.bf16.mxu0 %v1191_v14 }
 0x1cb   : > { %1531 = vmatpush3.bf16.msra.mxu0 %v1183_v24 }
 0x1cc   : > { %1532 = vmatprep.subr.bf16.mxu0 %v1190_v29 }
 0x1cf   : > { %1533 = vmatpush3.bf16.msra.mxu0 %v1182_v32 }
 0x1d0   : > { %1534 = vmatprep.subr.bf16.mxu0 %v1189_v35 }
 0x1d3   : > { %1535 = vmatpush3.bf16.msra.mxu0 %v1181_v36 }
 0x1d6   : > { %1237 = vmatmul.mubr.bf16.vlgmr.msra.gmra.mxu0 %v1404_v37 }
 0x296   : > { %v1536_v38 = vpop.f32.mrf.mxu0 }
 0x298   : > { %v1537_v39 = vpop.f32.mrf.mxu0 }
 0x299   : > { %v1538_v51 = vadd.f32 %v1537_v39, %v1536_v38 }
 0x29a   : > { %v1539_v40 = vpop.f32.mrf.mxu0 }
 0x29b   : > { %1244 = vst [vmem:[%s1955_s22] sm:$0xff] %v1538_v51 }
 0x29c   : > { %v1540_v41 = vpop.f32.mrf.mxu0 }
 0x29d PF: > { %s26_s11 = sadd.s32 1, %s1764_s11   ;;  %s2086_s1 = smov %s1744_s30 }
 0x29e   : > { %p23_p11 = scmp.ge.s32.totalorder %s26_s11, 11   ;;  %s2087_s30 = smov %s1865_s0 }
 0x29f   : > { %s2088_s7 = smov %s1756_s9  ;;  %s2089_s8 = smov %s1760_s10 }
 0x2a0   : > { %s2090_s9 = smov %s2093_s12  ;;  %s2091_s10 = smov %s2097_s13 }
 0x2a1   :  { %25 = sbr.rel (!%p23_p11) target bundleno = 29 (0x1d), region = 125 }

</bundles_post_ra>
